<compile_context>
chip_gen: v5e
topology: v5e:2x2
jax: 0.10.0
libtpu: 0.0.40
codegen_flags: <defaults>
</compile_context>

<pallas_src>
import functools

import numpy as np
import jax
import jax.numpy as jnp
from jax.experimental import pallas as pl
from jax.experimental.pallas import tpu as pltpu


# -----------------------------------------------------------------------------
# Pallas kernel: conv-as-GEMM with fused epilogue.
#   acc[o, m] = sum_k W[o, k] * cols[k, m] + bias[o]
#   out[o, m] = 2*sigmoid(acc[o, m])  if flag[o] == 1 else acc[o, m]
# Output lane axis = M (B*Ho*Wo), sublane axis = O  ->  lane-dense stores.
# Operands bf16, accumulation f32.
# -----------------------------------------------------------------------------
def _conv_gemm_kernel(w_ref, cols_ref, bias_ref, flag_ref, o_ref):
    acc = jnp.dot(w_ref[...], cols_ref[...], preferred_element_type=jnp.float32)
    acc = acc + jnp.broadcast_to(bias_ref[...], acc.shape)
    flag = jnp.broadcast_to(flag_ref[...], acc.shape)
    sig2 = 2.0 / (1.0 + jnp.exp(-acc))          # exp on EUP slot: ~free
    o_ref[...] = jnp.where(flag > 0.5, sig2, acc)


def _pallas_conv_gemm(w, cols, bias, flag, *, tm=640):
    """w: (Op, Kp) bf16, cols: (Kp, M) bf16, bias/flag: (Op, 1) f32 -> (Op, M) f32."""
    op, kp = w.shape
    kp2, m = cols.shape
    assert kp == kp2
    tm = min(tm, ((m + 127) // 128) * 128)      # lane-aligned M tile
    grid_m = pl.cdiv(m, tm)                     # ragged last block handled by Pallas
    return pl.pallas_call(
        _conv_gemm_kernel,
        out_shape=jax.ShapeDtypeStruct((op, m), jnp.float32),
        grid=(grid_m,),
        in_specs=[
            pl.BlockSpec((op, kp), lambda i: (0, 0)),   # tiny weight: fully resident
            pl.BlockSpec((kp, tm), lambda i: (0, i)),   # tile only the long M axis
            pl.BlockSpec((op, 1), lambda i: (0, 0)),    # bias (per out-channel)
            pl.BlockSpec((op, 1), lambda i: (0, 0)),    # epilogue flag (per channel)
        ],
        out_specs=pl.BlockSpec((op, tm), lambda i: (0, i)),
        compiler_params=pltpu.CompilerParams(
            dimension_semantics=("parallel",)),         # >=2 blocks -> both v7x TCs
    )(w, cols, bias, flag)
    # TODO(synk): if C*K*K ever grows to real channel counts, tile Kp with an
    # accumulator (pl.when init/finalize) instead of keeping the whole weight
    # resident, and set vmem_limit_bytes explicitly (v7x has 64 MiB VMEM).


def _gemm_conv_apply(w_mat, bias, flags, cols, batch, ho, wo):
    """Run the fused conv-GEMM head.
    w_mat: (O, C*KK) weight matrix; bias: (O,) or None; flags: (O,) 0/1 floats
    (1 -> apply 2*sigmoid in the epilogue); cols: (C*KK, B*Ho*Wo) bf16 columns.
    Returns (B, O, Ho, Wo) float32."""
    out_ch, ckk = w_mat.shape
    op = ((out_ch + 15) // 16) * 16          # sublane pad (bf16 tile = 16 sublanes)
    kp = ((ckk + 127) // 128) * 128          # lane-align the contraction dim

    w_p = jnp.zeros((op, kp), jnp.bfloat16)
    w_p = w_p.at[:out_ch, :ckk].set(jnp.asarray(w_mat, dtype=jnp.bfloat16))
    b_p = jnp.zeros((op, 1), jnp.float32)
    if bias is not None:
        b_p = b_p.at[:out_ch, 0].set(jnp.asarray(bias, dtype=jnp.float32))
    f_p = jnp.zeros((op, 1), jnp.float32)
    f_p = f_p.at[:out_ch, 0].set(jnp.asarray(flags, dtype=jnp.float32))

    cols_p = cols if ckk == kp else jnp.pad(cols, ((0, kp - ckk), (0, 0)))

    out = _pallas_conv_gemm(w_p, cols_p, b_p, f_p)          # (op, B*Ho*Wo) f32
    out = out[:out_ch].reshape(out_ch, batch, ho, wo).transpose(1, 0, 2, 3)
    return out


# -----------------------------------------------------------------------------
# im2col builders (XLA glue).
# -----------------------------------------------------------------------------
def _plain_im2col(x, ksize):
    """SAME-padding, stride-1, zero-offset im2col: (C*K*K, B*H*W) bf16."""
    b, c, h, w = x.shape
    pad = (ksize - 1) // 2
    xp = jnp.pad(x, ((0, 0), (0, 0), (pad, pad), (pad, pad)))
    taps = [xp[:, :, a:a + h, bb:bb + w]
            for a in range(ksize) for bb in range(ksize)]
    val = jnp.stack(taps, axis=2)                            # (B, C, KK, H, W)
    cols = val.transpose(1, 2, 0, 3, 4).reshape(c * ksize * ksize, b * h * w)
    return cols.astype(jnp.bfloat16)


def _bilinear_im2col(x, offset, mask, ksize, stride=1):
    """Deformable (torchvision-semantics) im2col: (C*K*K, B*Ho*Wo) bf16."""
    # TODO(synk): pull this bilinear gather + modulation inside the Pallas
    # kernel (manual DMA / PrefetchScalarGridSpec) to avoid the HBM-resident
    # gather/transpose chain; kept as XLA glue for now.
    b, c, h, w = x.shape
    kk = ksize * ksize
    pad = (ksize - 1) // 2
    ho, wo = offset.shape[2], offset.shape[3]
    dt = jnp.float32

    off = offset.reshape(b, kk, 2, ho, wo)
    dy = off[:, :, 0]
    dx = off[:, :, 1]
    ky = (jnp.arange(kk) // ksize).astype(dt)
    kx = (jnp.arange(kk) % ksize).astype(dt)
    base_y = (jnp.arange(ho) * stride - pad).astype(dt)
    base_x = (jnp.arange(wo) * stride - pad).astype(dt)

    py = dy + ky[None, :, None, None] + base_y[None, None, :, None]
    px = dx + kx[None, :, None, None] + base_x[None, None, None, :]

    y0 = jnp.floor(py)
    x0 = jnp.floor(px)
    y1 = y0 + 1.0
    x1 = x0 + 1.0
    wy1 = py - y0
    wy0 = 1.0 - wy1
    wx1 = px - x0
    wx0 = 1.0 - wx1

    xf = x.reshape(b, c, h * w).astype(dt)

    def gather(yi, xi):
        valid = ((yi >= 0) & (yi < h) & (xi >= 0) & (xi < w)).astype(dt)
        yc = jnp.clip(yi, 0, h - 1).astype(jnp.int32)
        xc = jnp.clip(xi, 0, w - 1).astype(jnp.int32)
        idx = (yc * w + xc).reshape(b, 1, kk * ho * wo)
        idx = jnp.broadcast_to(idx, (b, c, kk * ho * wo))
        g = jnp.take_along_axis(xf, idx, axis=2).reshape(b, c, kk, ho, wo)
        return g * valid[:, None]

    val = ((wy0 * wx0)[:, None] * gather(y0, x0)
           + (wy0 * wx1)[:, None] * gather(y0, x1)
           + (wy1 * wx0)[:, None] * gather(y1, x0)
           + (wy1 * wx1)[:, None] * gather(y1, x1))
    val = val * mask[:, None].astype(dt)                    # modulation mask

    cols = val.transpose(1, 2, 0, 3, 4).reshape(c * kk, b * ho * wo)
    return cols.astype(jnp.bfloat16)


# -----------------------------------------------------------------------------
# Jitted device heads (fuse the XLA glue around each Pallas call).
# -----------------------------------------------------------------------------
@functools.partial(jax.jit, static_argnames=("ksize",))
def _offset_modulator_head(x, w_om, b_om, flags_om, *, ksize):
    """Merged offset_conv + modulator_conv: one im2col, one Pallas GEMM.
    Returns (B, 3*K*K, H, W): first 2*K*K channels = offsets, last K*K =
    modulator (2*sigmoid already fused in the kernel epilogue)."""
    b, _, h, w = x.shape
    cols = _plain_im2col(x, ksize)
    return _gemm_conv_apply(w_om, b_om, flags_om, cols, b, h, w)


@functools.partial(jax.jit, static_argnames=("ksize",))
def _deform_conv_head(x, offset, modulator, w_reg, *, ksize):
    """Deformable sampling + Pallas GEMM for regular_conv (bias=False)."""
    b, _, h, w = x.shape
    cols = _bilinear_im2col(x, offset, modulator, ksize)
    flags = jnp.zeros((w_reg.shape[0],), jnp.float32)       # no activation
    return _gemm_conv_apply(w_reg, None, flags, cols, b, h, w)


# -----------------------------------------------------------------------------
# HDC weight masking (host side; data-dependent Python control flow, exactly
# mirroring the reference incl. try/except and negative-index wraparound).
# -----------------------------------------------------------------------------
def hdc(segment, centre_xlst, centre_ylst, true, weight):
    weight = np.array(weight, copy=True)
    try:
        for centre_num, cx, cy in zip(true, centre_xlst, centre_ylst):
            lst = [segment[cx - 1][cy - 1], segment[cx - 1][cy], segment[cx - 1][cy + 1],
                   segment[cx][cy - 1], segment[cx][cy], segment[cx][cy + 1],
                   segment[cx + 1][cy - 1], segment[cx + 1][cy], segment[cx + 1][cy + 1]]
            for i in range(len(lst)):
                if lst[i] != centre_num:
                    a, b = divmod(int(i), 3)
                    weight[:, :, a, b] = 0.0
    except Exception:
        return weight
    return weight


# -----------------------------------------------------------------------------
# Full SPGDeformableConv2d forward
# -----------------------------------------------------------------------------
def spg_deformable_conv2d_forward(source_x, params, segment):
    b, c_plus_1, h, w = source_x.shape
    c = c_plus_1 - 1
    ksize = params["w_reg"].shape[2]
    kk = ksize * ksize
    x = source_x[:, 0:c, :, :]

    # Host-side centre decoding (data-dependent Python, as in the reference).
    loc_source = np.asarray(source_x[:, -1, :, :])
    true, centre_xlst, centre_ylst = [], [], []
    for bi in range(b):
        loc_ = loc_source[bi].reshape(25, 25)
        centre_loc = loc_[12][12]
        centre_x, centre_y = divmod(int(centre_loc), 1000)
        centre_num = segment[centre_x][centre_y]
        centre_xlst.append(centre_x)
        centre_ylst.append(centre_y)
        true.append(centre_num)

    # Merged offset_conv (zero-init) + modulator_conv (zero-init, 2*sigmoid
    # fused in the kernel epilogue): one shared im2col, one Pallas GEMM.
    n_off = 2 * kk
    w_om = jnp.concatenate(
        [jnp.reshape(params["w_off"], (n_off, c * kk)),
         jnp.reshape(params["w_mod"], (kk, c * kk))], axis=0)
    b_om = jnp.concatenate([params["b_off"], params["b_mod"]], axis=0)
    flags_om = jnp.concatenate([jnp.zeros((n_off,), jnp.float32),
                                jnp.ones((kk,), jnp.float32)], axis=0)
    om = _offset_modulator_head(x, w_om, b_om, flags_om, ksize=ksize)
    offset = om[:, :n_off]          # (B, 2*KK, H, W)  == 0 (zero-init weights)
    modulator = om[:, n_off:]       # (B, KK, H, W)    == 1 (2*sigmoid(0))

    # HDC segment-driven masking of the regular conv weight (host side).
    w_reg_masked = hdc(segment, centre_xlst, centre_ylst, true,
                       np.asarray(params["w_reg"]))
    w_reg_mat = w_reg_masked.reshape(w_reg_masked.shape[0], c * kk)

    # Deformable conv: bilinear sampling + modulation + Pallas GEMM.
    out = _deform_conv_head(x, offset, modulator, w_reg_mat, ksize=ksize)
    return out


# -----------------------------------------------------------------------------
if __name__ == "__main__":
    key = jax.random.PRNGKey(0)
    in_channels, out_channels, K = 4, 8, 3
    B, H, W = 2, 25, 25          # loc channel is reshaped to (25, 25) in forward

    # deterministic "segment" map (nested Python list, like segment.tolist())
    segment = [[(i // 3) * 2 + (j // 3) for j in range(8)] for i in range(8)]

    # parameters (per __init__): offset/modulator convs zero-init; regular conv
    # uses PyTorch-style uniform(-1/sqrt(fan_in), 1/sqrt(fan_in)).
    k_w, k_x = jax.random.split(key)
    fan_in = in_channels * K * K
    bound = 1.0 / np.sqrt(fan_in)
    params = {
        "w_reg": jax.random.uniform(k_w, (out_channels, in_channels, K, K),
                                    jnp.float32, -bound, bound),
        "w_off": jnp.zeros((2 * K * K, in_channels, K, K), jnp.float32),
        "b_off": jnp.zeros((2 * K * K,), jnp.float32),
        "w_mod": jnp.zeros((K * K, in_channels, K, K), jnp.float32),
        "b_mod": jnp.zeros((K * K,), jnp.float32),
    }

    # input: C data channels + 1 "loc" channel encoding centre_x*1000+centre_y
    x_data = jax.random.normal(k_x, (B, in_channels, H, W), jnp.float32)
    centres = [(2, 3), (4, 4)]
    loc = np.zeros((B, H, W), np.float32)
    for bi, (cx, cy) in enumerate(centres):
        loc[bi, :, :] = cx * 1000 + cy
    source_x = jnp.concatenate([x_data, jnp.asarray(loc)[:, None]], axis=1)

    out = spg_deformable_conv2d_forward(source_x, params, segment)
    out = jax.block_until_ready(out)
    assert out.shape == (B, out_channels, H, W), out.shape
    assert bool(jnp.all(jnp.isfinite(out)))
    print("KERNEL_OK")
</pallas_src>

<mosaic_0001>
module attributes {stable_mosaic.version = 11 : i64} {
  func.func @_conv_gemm_kernel(%arg0: i32, %arg1: memref<32x128xbf16, #tpu.memory_space<vmem>>, %arg2: memref<128x640xbf16, #tpu.memory_space<vmem>>, %arg3: memref<32x1xf32, #tpu.memory_space<vmem>>, %arg4: memref<32x1xf32, #tpu.memory_space<vmem>>, %arg5: memref<32x640xf32, #tpu.memory_space<vmem>>) attributes {dimension_semantics = [#tpu.dimension_semantics<parallel>], iteration_bounds = array<i64: 2>, scalar_prefetch = 0 : i64, scratch_operands = 0 : i64, tpu.core_type = #tpu.core_type<tc>, window_params = [{pipeline_mode = #tpu.pipeline_mode<synchronous>, transform_indices = @transform_0, window_bounds = array<i64: 32, 128>}, {transform_indices = @transform_1, window_bounds = array<i64: 128, 640>}, {pipeline_mode = #tpu.pipeline_mode<synchronous>, transform_indices = @transform_2, window_bounds = array<i64: 32, 1>}, {pipeline_mode = #tpu.pipeline_mode<synchronous>, transform_indices = @transform_3, window_bounds = array<i64: 32, 1>}, {transform_indices = @transform_4, window_bounds = array<i64: 32, 640>}]} {
    %c0 = arith.constant 0 : index
    %c0_0 = arith.constant 0 : index
    %0 = vector.load %arg1[%c0, %c0_0] : memref<32x128xbf16, #tpu.memory_space<vmem>>, vector<32x128xbf16>
    %c0_1 = arith.constant 0 : index
    %c0_2 = arith.constant 0 : index
    %1 = vector.load %arg2[%c0_1, %c0_2] : memref<128x640xbf16, #tpu.memory_space<vmem>>, vector<128x640xbf16>
    %cst = arith.constant dense<0.000000e+00> : vector<32x640xf32>
    %2 = tpu.matmul %0, %1, %cst {dimension_numbers = #tpu.dot_dimension_numbers<[1], [0], [0], [1], [0, 0, 1, 1], [], []>} : vector<32x128xbf16>, vector<128x640xbf16>, vector<32x640xf32> -> vector<32x640xf32>
    %c0_3 = arith.constant 0 : index
    %c0_4 = arith.constant 0 : index
    %3 = vector.load %arg3[%c0_3, %c0_4] : memref<32x1xf32, #tpu.memory_space<vmem>>, vector<32x1xf32>
    %4 = vector.shape_cast %3 : vector<32x1xf32> to vector<32x1xf32>
    %5 = vector.broadcast %4 : vector<32x1xf32> to vector<32x640xf32>
    %6 = arith.addf %2, %5 : vector<32x640xf32>
    %c0_5 = arith.constant 0 : index
    %c0_6 = arith.constant 0 : index
    %7 = vector.load %arg4[%c0_5, %c0_6] : memref<32x1xf32, #tpu.memory_space<vmem>>, vector<32x1xf32>
    %8 = vector.shape_cast %7 : vector<32x1xf32> to vector<32x1xf32>
    %9 = vector.broadcast %8 : vector<32x1xf32> to vector<32x640xf32>
    %cst_7 = arith.constant 0.000000e+00 : f32
    %10 = vector.broadcast %cst_7 : f32 to vector<32x640xf32>
    %11 = arith.subf %10, %6 : vector<32x640xf32>
    %12 = math.exp %11 : vector<32x640xf32>
    %cst_8 = arith.constant 1.000000e+00 : f32
    %13 = vector.broadcast %cst_8 : f32 to vector<32x640xf32>
    %14 = arith.addf %13, %12 : vector<32x640xf32>
    %cst_9 = arith.constant 2.000000e+00 : f32
    %15 = vector.broadcast %cst_9 : f32 to vector<32x640xf32>
    %16 = arith.divf %15, %14 : vector<32x640xf32>
    %cst_10 = arith.constant 5.000000e-01 : f32
    %17 = vector.broadcast %cst_10 : f32 to vector<32x640xf32>
    %18 = arith.cmpf ogt, %9, %17 : vector<32x640xf32>
    %19 = arith.select %18, %16, %6 : vector<32x640xi1>, vector<32x640xf32>
    %c0_11 = arith.constant 0 : index
    %c0_12 = arith.constant 0 : index
    %20 = vector.load %arg5[%c0_11, %c0_12] : memref<32x640xf32, #tpu.memory_space<vmem>>, vector<32x640xf32>
    tpu.vector_store %arg5[%c0_11, %c0_12], %19 {strides = array<i32>} : memref<32x640xf32, #tpu.memory_space<vmem>>, vector<32x640xf32>,
    return
  }
  func.func @transform_0(%arg0: i32) -> (i32, i32) {
    %c0_i32 = arith.constant 0 : i32
    %c0_i32_0 = arith.constant 0 : i32
    %c0_i32_1 = arith.constant 0 : i32
    return %c0_i32, %c0_i32_0 : i32, i32
  }
  func.func @transform_1(%arg0: i32) -> (i32, i32) {
    %c0_i32 = arith.constant 0 : i32
    %c0_i32_0 = arith.constant 0 : i32
    return %c0_i32, %arg0 : i32, i32
  }
  func.func @transform_2(%arg0: i32) -> (i32, i32) {
    %c0_i32 = arith.constant 0 : i32
    %c0_i32_0 = arith.constant 0 : i32
    %c0_i32_1 = arith.constant 0 : i32
    return %c0_i32, %c0_i32_0 : i32, i32
  }
  func.func @transform_3(%arg0: i32) -> (i32, i32) {
    %c0_i32 = arith.constant 0 : i32
    %c0_i32_0 = arith.constant 0 : i32
    %c0_i32_1 = arith.constant 0 : i32
    return %c0_i32, %c0_i32_0 : i32, i32
  }
  func.func @transform_4(%arg0: i32) -> (i32, i32) {
    %c0_i32 = arith.constant 0 : i32
    %c0_i32_0 = arith.constant 0 : i32
    return %c0_i32, %arg0 : i32, i32
  }
}

</mosaic_0001>

<bundles_post_ra>
// kernel: _offset_modulator_head.1
= control target key start
LH: loop header
LB: loop body
LE: loop exit
PB: predicated region body
PF: predicated region fallthrough
CT: control target
= control target key end

     0   :  { %s1704_s15 = smov 0   ;;  %s1706_s16 = smov 0   ;;  %s2604_s0 = inlined_call_operand.vmem [shape: bf16[32,128], index: 0, kind: input, shape index: {}]   ;;  %s2605_s1 = inlined_call_operand.vmem [shape: bf16[128,1250], index: 1, kind: input, shape index: {}]   ;;  %s2606_s2 = inlined_call_operand.vmem [shape: f32[32,1], index: 2, kind: input, shape index: {}]   ;;  %s2607_s3 = inlined_call_operand.vmem [shape: f32[32,1], index: 3, kind: input, shape index: {}]   ;;  %s2608_s4 = inlined_call_operand.vmem [shape: f32[32,1250], index: 4, kind: output, shape index: {}]  }
   0x1   :  { %s1708_s17 = smov 0  }
   0x2 LB: > { %s1282_s18 = sadd.s32 4294967295, %s1676_s17   ;;  %s1721_s19 = sadd.s32 1, %s1676_s17   ;;  %s1676_s17 = sphi %s1708_s17, %s2712_s17   ;;  %s1672_s16 = sphi %s1706_s16, %s2711_s16   ;;  %s1668_s15 = sphi %s1704_s15, %s2710_s15  }
   0x3   : > { %s39_s20 = ssub.s32 %s1676_s17, %s1721_s19  ;;  %s42_s21 = sadd.s32 1, %s1672_s16 }
   0x4   : > { %p40_p0 = scmp.eq.s32.totalorder %s39_s20, 0  ;;  %p49_p1 = scmp.ne.s32.totalorder %s1672_s16, %s1668_s15 }
   0x5   : > { %p50_p2 = scmp.eq.s32.totalorder %s1676_s17, 0  ;;  %p121_p3 = scmp.eq.s32.totalorder %s1282_s18, 1 }
   0x6   : > { %s1732_s22 = scalar_select %p40_p0, %s1672_s16, %s42_s21  }
   0x7   : > { %p51_p4 = por %p50_p2, %p49_p1  ;;  %p1734_p5 = por %p121_p3, %p49_p1 }
   0x8   : > { %p1285_p6 = scmp.ge.s32.totalorder %s1676_s17, 2 }
   0xa   : > { %152 = sbr.rel (%p1285_p6) target bundleno = 68 (0x44), region = 28 }
   0xf   : > { %155 = sbr.rel (!%p51_p4) target bundleno = 68 (0x44), region = 32  ;;  %s157_s24 = sand.u32 (%p51_p4), 1, %s1672_s16  }
  0x10   : > { %s1491_s25 = smul.u32 (%p51_p4), 20, %s1676_s17 }
  0x11   : > { %s1543_s26 = smul.u32 (%p51_p4), 320, %s157_s24 }
  0x12   : > { %s1744_s29 = scalar_lea.vmem (%p51_p4), %s2605_s1, %s1491_s25 }
  0x13   : > { %v177_v0 = vld [vmem:[%s1744_s29] sm:$0xff] (%p51_p4)  ;;  %v179_v1 = vld [vmem:[%s1744_s29 + $0x8] sm:$0xff] (%p51_p4)  ;;  %s1749_s30 = scalar_lea.vmem (%p51_p4), [#allocation2], %s1543_s26  ;;  %v183_v3 = vld [vmem:[%s1744_s29 + $0x30] sm:$0xff] (%p51_p4) }
  0x14   : > { %v181_v2 = vld [vmem:[%s1744_s29 + $0x28] sm:$0xff]  ;;  %178 = vst [vmem:[%s1749_s30] sm:$0xff] %v177_v0  ;;  %v185_v4 = vld [vmem:[%s1744_s29 + $0x50] sm:$0xff]  ;;  %v187_v5 = vld [vmem:[%s1744_s29 + $0x58] sm:$0xff] }
  0x15   : > { %180 = vst [vmem:[%s1749_s30 + $0x8] sm:$0xff] %v179_v1  ;;  %v189_v6 = vld [vmem:[%s1744_s29 + $0x78] sm:$0xff]  ;;  %v191_v7 = vld [vmem:[%s1744_s29 + $0x80] sm:$0xff]  ;;  %v195_v9 = vld [vmem:[%s1744_s29 + $0xa8] sm:$0xff] }
  0x16   : > { %182 = vst [vmem:[%s1749_s30 + $0x14] sm:$0xff] %v181_v2  ;;  %v193_v8 = vld [vmem:[%s1744_s29 + $0xa0] sm:$0xff]  ;;  %v197_v10 = vld [vmem:[%s1744_s29 + $0xc8] sm:$0xff]  ;;  %v199_v11 = vld [vmem:[%s1744_s29 + $0xd0] sm:$0xff] }
  0x17   : > { %184 = vst [vmem:[%s1749_s30 + $0x1c] sm:$0xff] %v183_v3  ;;  %v201_v12 = vld [vmem:[%s1744_s29 + $0xf0] sm:$0xff]  ;;  %v203_v13 = vld [vmem:[%s1744_s29 + $0xf8] sm:$0xff]  ;;  %v207_v15 = vld [vmem:[%s1744_s29 + $0x120] sm:$0xff] }
  0x18   : > { %186 = vst [vmem:[%s1749_s30 + $0x28] sm:$0xff] %v185_v4  ;;  %v205_v14 = vld [vmem:[%s1744_s29 + $0x118] sm:$0xff]  ;;  %v209_v16 = vld [vmem:[%s1744_s29 + $0x140] sm:$0xff]  ;;  %v211_v17 = vld [vmem:[%s1744_s29 + $0x148] sm:$0xff] }
  0x19   : > { %188 = vst [vmem:[%s1749_s30 + $0x30] sm:$0xff] %v187_v5  ;;  %v213_v18 = vld [vmem:[%s1744_s29 + $0x168] sm:$0xff]  ;;  %v215_v19 = vld [vmem:[%s1744_s29 + $0x170] sm:$0xff]  ;;  %v219_v21 = vld [vmem:[%s1744_s29 + $0x198] sm:$0xff] }
  0x1a   : > { %190 = vst [vmem:[%s1749_s30 + $0x3c] sm:$0xff] %v189_v6  ;;  %v217_v20 = vld [vmem:[%s1744_s29 + $0x190] sm:$0xff]  ;;  %v221_v22 = vld [vmem:[%s1744_s29 + $0x1b8] sm:$0xff]  ;;  %v223_v23 = vld [vmem:[%s1744_s29 + $0x1c0] sm:$0xff] }
  0x1b   : > { %192 = vst [vmem:[%s1749_s30 + $0x44] sm:$0xff] %v191_v7  ;;  %v225_v24 = vld [vmem:[%s1744_s29 + $0x1e0] sm:$0xff]  ;;  %v227_v25 = vld [vmem:[%s1744_s29 + $0x1e8] sm:$0xff]  ;;  %v231_v27 = vld [vmem:[%s1744_s29 + $0x210] sm:$0xff] }
  0x1c   : > { %194 = vst [vmem:[%s1749_s30 + $0x50] sm:$0xff] %v193_v8  ;;  %v229_v26 = vld [vmem:[%s1744_s29 + $0x208] sm:$0xff]  ;;  %v233_v28 = vld [vmem:[%s1744_s29 + $0x230] sm:$0xff]  ;;  %v235_v29 = vld [vmem:[%s1744_s29 + $0x238] sm:$0xff] }
  0x1d   : > { %196 = vst [vmem:[%s1749_s30 + $0x58] sm:$0xff] %v195_v9  ;;  %v237_v30 = vld [vmem:[%s1744_s29 + $0x258] sm:$0xff]  ;;  %v239_v31 = vld [vmem:[%s1744_s29 + $0x260] sm:$0xff]  ;;  %v1287_v32 = vld [vmem:[%s1744_s29 + $0x10] sm:$0xf] }
  0x1e   : > { %198 = vst [vmem:[%s1749_s30 + $0x64] sm:$0xff] %v197_v10  ;;  %v1289_v33 = vld [vmem:[%s1744_s29 + $0x38] sm:$0xf]  ;;  %v1291_v34 = vld [vmem:[%s1744_s29 + $0x60] sm:$0xf] }
  0x1f   : > { %200 = vst [vmem:[%s1749_s30 + $0x6c] sm:$0xff] %v199_v11  ;;  %v1293_v35 = vld [vmem:[%s1744_s29 + $0x88] sm:$0xf]  ;;  %v1295_v36 = vld [vmem:[%s1744_s29 + $0xb0] sm:$0xf] }
  0x20   : > { %202 = vst [vmem:[%s1749_s30 + $0x78] sm:$0xff] %v201_v12  ;;  %v1297_v37 = vld [vmem:[%s1744_s29 + $0xd8] sm:$0xf]  ;;  %v1299_v38 = vld [vmem:[%s1744_s29 + $0x100] sm:$0xf] }
  0x21   : > { %204 = vst [vmem:[%s1749_s30 + $0x80] sm:$0xff] %v203_v13  ;;  %v1301_v39 = vld [vmem:[%s1744_s29 + $0x128] sm:$0xf]  ;;  %v1303_v40 = vld [vmem:[%s1744_s29 + $0x150] sm:$0xf] }
  0x22   : > { %206 = vst [vmem:[%s1749_s30 + $0x8c] sm:$0xff] %v205_v14  ;;  %v1305_v41 = vld [vmem:[%s1744_s29 + $0x178] sm:$0xf]  ;;  %v1307_v42 = vld [vmem:[%s1744_s29 + $0x1a0] sm:$0xf] }
  0x23   : > { %208 = vst [vmem:[%s1749_s30 + $0x94] sm:$0xff] %v207_v15  ;;  %v1309_v43 = vld [vmem:[%s1744_s29 + $0x1c8] sm:$0xf]  ;;  %v1311_v44 = vld [vmem:[%s1744_s29 + $0x1f0] sm:$0xf] }
  0x24   : > { %210 = vst [vmem:[%s1749_s30 + $0xa0] sm:$0xff] %v209_v16  ;;  %v1313_v45 = vld [vmem:[%s1744_s29 + $0x218] sm:$0xf]  ;;  %v1315_v46 = vld [vmem:[%s1744_s29 + $0x240] sm:$0xf] }
  0x25   : > { %212 = vst [vmem:[%s1749_s30 + $0xa8] sm:$0xff] %v211_v17  ;;  %v1317_v47 = vld [vmem:[%s1744_s29 + $0x268] sm:$0xf] }
  0x26   : > { %214 = vst [vmem:[%s1749_s30 + $0xb4] sm:$0xff] %v213_v18 }
  0x27   : > { %216 = vst [vmem:[%s1749_s30 + $0xbc] sm:$0xff] %v215_v19 }
  0x28   : > { %218 = vst [vmem:[%s1749_s30 + $0xc8] sm:$0xff] %v217_v20 }
  0x29   : > { %220 = vst [vmem:[%s1749_s30 + $0xd0] sm:$0xff] %v219_v21 }
  0x2a   : > { %222 = vst [vmem:[%s1749_s30 + $0xdc] sm:$0xff] %v221_v22 }
  0x2b   : > { %224 = vst [vmem:[%s1749_s30 + $0xe4] sm:$0xff] %v223_v23 }
  0x2c   : > { %226 = vst [vmem:[%s1749_s30 + $0xf0] sm:$0xff] %v225_v24 }
  0x2d   : > { %228 = vst [vmem:[%s1749_s30 + $0xf8] sm:$0xff] %v227_v25 }
  0x2e   : > { %230 = vst [vmem:[%s1749_s30 + $0x104] sm:$0xff] %v229_v26 }
  0x2f   : > { %232 = vst [vmem:[%s1749_s30 + $0x10c] sm:$0xff] %v231_v27 }
  0x30   : > { %234 = vst [vmem:[%s1749_s30 + $0x118] sm:$0xff] %v233_v28 }
  0x31   : > { %236 = vst [vmem:[%s1749_s30 + $0x120] sm:$0xff] %v235_v29 }
  0x32   : > { %238 = vst [vmem:[%s1749_s30 + $0x12c] sm:$0xff] %v237_v30 }
  0x33   : > { %240 = vst [vmem:[%s1749_s30 + $0x134] sm:$0xff] %v239_v31 }
  0x34   : > { %1288 = vst [vmem:[%s1749_s30 + $0x10] sm:$0xf] %v1287_v32 }
  0x35   : > { %1290 = vst [vmem:[%s1749_s30 + $0x24] sm:$0xf] %v1289_v33 }
  0x36   : > { %1292 = vst [vmem:[%s1749_s30 + $0x38] sm:$0xf] %v1291_v34 }
  0x37   : > { %1294 = vst [vmem:[%s1749_s30 + $0x4c] sm:$0xf] %v1293_v35 }
  0x38   : > { %1296 = vst [vmem:[%s1749_s30 + $0x60] sm:$0xf] %v1295_v36 }
  0x39   : > { %1298 = vst [vmem:[%s1749_s30 + $0x74] sm:$0xf] %v1297_v37 }
  0x3a   : > { %1300 = vst [vmem:[%s1749_s30 + $0x88] sm:$0xf] %v1299_v38 }
  0x3b   : > { %1302 = vst [vmem:[%s1749_s30 + $0x9c] sm:$0xf] %v1301_v39 }
  0x3c   : > { %1304 = vst [vmem:[%s1749_s30 + $0xb0] sm:$0xf] %v1303_v40 }
  0x3d   : > { %1306 = vst [vmem:[%s1749_s30 + $0xc4] sm:$0xf] %v1305_v41 }
  0x3e   : > { %1308 = vst [vmem:[%s1749_s30 + $0xd8] sm:$0xf] %v1307_v42 }
  0x3f   : > { %1310 = vst [vmem:[%s1749_s30 + $0xec] sm:$0xf] %v1309_v43 }
  0x40   : > { %1312 = vst [vmem:[%s1749_s30 + $0x100] sm:$0xf] %v1311_v44 }
  0x41   : > { %1314 = vst [vmem:[%s1749_s30 + $0x114] sm:$0xf] %v1313_v45 }
  0x42   : > { %1316 = vst [vmem:[%s1749_s30 + $0x128] sm:$0xf] %v1315_v46 }
  0x43   : > { %1318 = vst [vmem:[%s1749_s30 + $0x13c] sm:$0xf] %v1317_v47 }
  0x44 PF: > { %p1319_p7 = scmp.ge.s32.totalorder %s1676_s17, 1  ;;  %p285_p8 = scmp.lt.s32.totalorder %s1676_s17, 3 }
  0x46   : > { %p286_p9 = pnand %p1319_p7, %p285_p8 }
  0x48   : > { %289 = sbr.rel (%p286_p9) target bundleno = 375 (0x177), region = 58 }
  0x4d   : > { %s292_s5 = sand.u32 1, %s1668_s15  }
  0x4e   : > { %s1544_s6 = smul.u32 320, %s292_s5 }
  0x50   : > { %s1849_s7 = scalar_lea.vmem [#allocation2], %s1544_s6 }
  0x51   : > { %v1470_v48 = vld [vmem:[%s1849_s7 + $0x118] sm:$0xf]  ;;  %v1531_v49 = vld [vmem:[%s1849_s7 + $0x128] sm:$0xf0]  ;;  %v1529_v50 = vld [vmem:[%s1849_s7 + $0x11c] sm:$0xf] }
  0x52   : > { %v1471_v51 = vor.u32 %v1531_v49, %v1470_v48  ;;  %v1472_v52 = vld [vmem:[%s1849_s7 + $0x12c] sm:$0xf0]  ;;  %v1478_v53 = vld [vmem:[%s1849_s7 + $0x120] sm:$0xf]  ;;  %v1532_v54 = vld [vmem:[%s1849_s7 + $0x130] sm:$0xf0] }
  0x53   : > { %v1475_v55 = vor.u32 %v1529_v50, %v1472_v52  ;;  %v1479_v56 = vor.u32 %v1532_v54, %v1478_v53  ;;  %v1530_v57 = vld [vmem:[%s1849_s7 + $0x124] sm:$0xf]  ;;  %v1480_v58 = vld [vmem:[%s1849_s7 + $0x134] sm:$0xf0]  ;;  %v1450_v59 = vld [vmem:[%s1849_s7 + $0xf0] sm:$0xf] }
  0x54   : > { %614 = vmatpush.bf16.msra.mxu0 %v1471_v51  ;;  %v1483_v60 = vor.u32 %v1530_v57, %v1480_v58  ;;  %v1526_v61 = vld [vmem:[%s1849_s7 + $0x100] sm:$0xf0]  ;;  %v1524_v62 = vld [vmem:[%s1849_s7 + $0xf4] sm:$0xf]  ;;  %v1452_v63 = vld [vmem:[%s1849_s7 + $0x104] sm:$0xf0] }
  0x55   : > { %633 = vmatpush.bf16.msra.mxu1 %v1475_v55  ;;  %652 = vmatpush.bf16.msra.mxu2 %v1479_v56  ;;  %v1451_v0 = vor.u32 %v1526_v61, %v1450_v59  ;;  %v1455_v1 = vor.u32 %v1524_v62, %v1452_v63  ;;  %v1458_v2 = vld [vmem:[%s1849_s7 + $0xf8] sm:$0xf]  ;;  %v1527_v3 = vld [vmem:[%s1849_s7 + $0x108] sm:$0xf0]  ;;  %v1525_v4 = vld [vmem:[%s1849_s7 + $0xfc] sm:$0xf] }
  0x56   : > { %671 = vmatpush.bf16.msra.mxu3 %v1483_v60  ;;  %v1459_v5 = vor.u32 %v1527_v3, %v1458_v2  ;;  %v1460_v6 = vld [vmem:[%s1849_s7 + $0x10c] sm:$0xf0]  ;;  %v1430_v7 = vld [vmem:[%s1849_s7 + $0xc8] sm:$0xf]  ;;  %v1521_v8 = vld [vmem:[%s1849_s7 + $0xd8] sm:$0xf0] }
  0x57   : > { %v1463_v9 = vor.u32 %v1525_v4, %v1460_v6  ;;  %v1519_v10 = vld [vmem:[%s1849_s7 + $0xcc] sm:$0xf]  ;;  %v1432_v11 = vld [vmem:[%s1849_s7 + $0xdc] sm:$0xf0]  ;;  %v1438_v12 = vld [vmem:[%s1849_s7 + $0xd0] sm:$0xf]  ;;  %v1431_v13 = vor.u32 %v1521_v8, %v1430_v7 }
  0x58   : > { %615 = vmatpush.bf16.msra.mxu0 %v1451_v0  ;;  %v1522_v14 = vld [vmem:[%s1849_s7 + $0xe0] sm:$0xf0]  ;;  %v1520_v15 = vld [vmem:[%s1849_s7 + $0xd4] sm:$0xf]  ;;  %v1440_v16 = vld [vmem:[%s1849_s7 + $0xe4] sm:$0xf0]  ;;  %v1435_v17 = vor.u32 %v1519_v10, %v1432_v11 }
  0x59   : > { %634 = vmatpush.bf16.msra.mxu1 %v1455_v1  ;;  %653 = vmatpush.bf16.msra.mxu2 %v1459_v5  ;;  %v1439_v18 = vor.u32 %v1522_v14, %v1438_v12  ;;  %v1410_v19 = vld [vmem:[%s1849_s7 + $0xa0] sm:$0xf]  ;;  %v1516_v20 = vld [vmem:[%s1849_s7 + $0xb0] sm:$0xf0]  ;;  %v1514_v21 = vld [vmem:[%s1849_s7 + $0xa4] sm:$0xf]  ;;  %v1443_v22 = vor.u32 %v1520_v15, %v1440_v16 }
  0x5a   : > { %672 = vmatpush.bf16.msra.mxu3 %v1463_v9  ;;  %v1412_v23 = vld [vmem:[%s1849_s7 + $0xb4] sm:$0xf0]  ;;  %v1418_v24 = vld [vmem:[%s1849_s7 + $0xa8] sm:$0xf]  ;;  %v1517_v25 = vld [vmem:[%s1849_s7 + $0xb8] sm:$0xf0]  ;;  %v1411_v28 = vor.u32 %v1516_v20, %v1410_v19 }
  0x5b   : > { %v1515_v26 = vld [vmem:[%s1849_s7 + $0xac] sm:$0xf]  ;;  %v1420_v27 = vld [vmem:[%s1849_s7 + $0xbc] sm:$0xf0]  ;;  %v1415_v29 = vor.u32 %v1514_v21, %v1412_v23  ;;  %v1419_v30 = vor.u32 %v1517_v25, %v1418_v24  ;;  %v1390_v31 = vld [vmem:[%s1849_s7 + $0x78] sm:$0xf] }
  0x5c   : > { %616 = vmatpush.bf16.msra.mxu0 %v1431_v13  ;;  %v1511_v32 = vld [vmem:[%s1849_s7 + $0x88] sm:$0xf0]  ;;  %v1509_v33 = vld [vmem:[%s1849_s7 + $0x7c] sm:$0xf]  ;;  %v1423_v34 = vor.u32 %v1515_v26, %v1420_v27  ;;  %v1392_v35 = vld [vmem:[%s1849_s7 + $0x8c] sm:$0xf0] }
  0x5d   : > { %635 = vmatpush.bf16.msra.mxu1 %v1435_v17  ;;  %654 = vmatpush.bf16.msra.mxu2 %v1439_v18  ;;  %v1398_v36 = vld [vmem:[%s1849_s7 + $0x80] sm:$0xf]  ;;  %v1512_v37 = vld [vmem:[%s1849_s7 + $0x90] sm:$0xf0]  ;;  %v1510_v38 = vld [vmem:[%s1849_s7 + $0x84] sm:$0xf]  ;;  %v1391_v40 = vor.u32 %v1511_v32, %v1390_v31  ;;  %v1395_v41 = vor.u32 %v1509_v33, %v1392_v35 }
  0x5e   : > { %673 = vmatpush.bf16.msra.mxu3 %v1443_v22  ;;  %v1400_v39 = vld [vmem:[%s1849_s7 + $0x94] sm:$0xf0]  ;;  %v1399_v42 = vor.u32 %v1512_v37, %v1398_v36  ;;  %v1370_v43 = vld [vmem:[%s1849_s7 + $0x50] sm:$0xf]  ;;  %v1506_v44 = vld [vmem:[%s1849_s7 + $0x60] sm:$0xf0] }
  0x5f   : > { %v1504_v45 = vld [vmem:[%s1849_s7 + $0x54] sm:$0xf]  ;;  %v1403_v46 = vor.u32 %v1510_v38, %v1400_v39  ;;  %v1372_v47 = vld [vmem:[%s1849_s7 + $0x64] sm:$0xf0]  ;;  %v1378_v48 = vld [vmem:[%s1849_s7 + $0x58] sm:$0xf]  ;;  %v1371_v52 = vor.u32 %v1506_v44, %v1370_v43 }
  0x60   : > { %617 = vmatpush.bf16.msra.mxu0 %v1411_v28  ;;  %v1507_v49 = vld [vmem:[%s1849_s7 + $0x68] sm:$0xf0]  ;;  %v1505_v50 = vld [vmem:[%s1849_s7 + $0x5c] sm:$0xf]  ;;  %v1380_v51 = vld [vmem:[%s1849_s7 + $0x6c] sm:$0xf0]  ;;  %v1375_v54 = vor.u32 %v1504_v45, %v1372_v47 }
  0x61   : > { %636 = vmatpush.bf16.msra.mxu1 %v1415_v29  ;;  %655 = vmatpush.bf16.msra.mxu2 %v1419_v30  ;;  %v1350_v53 = vld [vmem:[%s1849_s7 + $0x28] sm:$0xf]  ;;  %v1379_v55 = vor.u32 %v1507_v49, %v1378_v48  ;;  %v1501_v56 = vld [vmem:[%s1849_s7 + $0x38] sm:$0xf0]  ;;  %v1499_v57 = vld [vmem:[%s1849_s7 + $0x2c] sm:$0xf]  ;;  %v1383_v59 = vor.u32 %v1505_v50, %v1380_v51 }
  0x62   : > { %674 = vmatpush.bf16.msra.mxu3 %v1423_v34  ;;  %v1352_v58 = vld [vmem:[%s1849_s7 + $0x3c] sm:$0xf0]  ;;  %v1358_v60 = vld [vmem:[%s1849_s7 + $0x30] sm:$0xf]  ;;  %v1502_v61 = vld [vmem:[%s1849_s7 + $0x40] sm:$0xf0]  ;;  %v1351_v1 = vor.u32 %v1501_v56, %v1350_v53 }
  0x63   : > { %v1500_v62 = vld [vmem:[%s1849_s7 + $0x34] sm:$0xf]  ;;  %v1360_v63 = vld [vmem:[%s1849_s7 + $0x44] sm:$0xf0]  ;;  %v1678_v0 = vmov 0   ;;  %v370_v3 = vld [vmem:[%s2606_s2] sm:$0xff]  ;;  %v1355_v4 = vor.u32 %v1499_v57, %v1352_v58  ;;  %v1359_v5 = vor.u32 %v1502_v61, %v1358_v60 }
  0x64   : > { %618 = vmatpush.bf16.msra.mxu0 %v1391_v40  ;;  %1571 = vset.pattern.permute.xlu0 %v1678_v0  ;;  %v1330_v2 = vld [vmem:[%s1849_s7] sm:$0xf]  ;;  %v1496_v6 = vld [vmem:[%s1849_s7 + $0x10] sm:$0xf0]  ;;  %v1494_v7 = vld [vmem:[%s1849_s7 + $0x4] sm:$0xf]  ;;  %v1363_v9 = vor.u32 %v1500_v62, %v1360_v63 }
  0x65   : > { %637 = vmatpush.bf16.msra.mxu1 %v1395_v41  ;;  %656 = vmatpush.bf16.msra.mxu2 %v1399_v42  ;;  %v1332_v8 = vld [vmem:[%s1849_s7 + $0x14] sm:$0xf0]  ;;  %v1338_v10 = vld [vmem:[%s1849_s7 + $0x8] sm:$0xf]  ;;  %v1497_v11 = vld [vmem:[%s1849_s7 + $0x18] sm:$0xf0]  ;;  %v1331_v16 = vor.u32 %v1496_v6, %v1330_v2 }
  0x66   : > { %675 = vmatpush.bf16.msra.mxu3 %v1403_v46  ;;  %1572 = vset.pattern.permute.xlu1 %v1678_v0  ;;  %v1495_v12 = vld [vmem:[%s1849_s7 + $0xc] sm:$0xf]  ;;  %v1340_v13 = vld [vmem:[%s1849_s7 + $0x1c] sm:$0xf0]  ;;  %v1486_v14 = vld [vmem:[%s1849_s7 + $0x128] sm:$0xf]  ;;  %v1335_v18 = vor.u32 %v1494_v7, %v1332_v8  ;;  %v1339_v19 = vor.u32 %v1497_v11, %v1338_v10 }
  0x67   : > { %1573 = vset.pattern.permute.xlu2 %v1678_v0  ;;  %376 = vperm.xlu0 %1571, %v370_v3   ;;  %v1533_v15 = vld [vmem:[%s1849_s7 + $0x138] sm:$0xf0]  ;;  %v372_v17 = vld [vmem:[%s2606_s2 + $0x10] sm:$0xff]  ;;  %v1343_v20 = vor.u32 %v1495_v12, %v1340_v13  ;;  %v1492_v22 = vld [vmem:[%s2604_s0] sm:$0xff] }
  0x68   : > { %619 = vmatpush.bf16.msra.mxu0 %v1371_v52  ;;  %v1487_v21 = vor.u32 %v1533_v15, %v1486_v14  ;;  %386 = vperm.xlu1 %1572, %v372_v17   ;;  %v1466_v23 = vld [vmem:[%s1849_s7 + $0x100] sm:$0xf]  ;;  %v1528_v24 = vld [vmem:[%s1849_s7 + $0x110] sm:$0xf0]  ;;  %v371_v26 = vld [vmem:[%s2606_s2 + $0x8] sm:$0xff] }
  0x69   : > { %638 = vmatpush.bf16.msra.mxu1 %v1375_v54  ;;  %657 = vmatpush.bf16.msra.mxu2 %v1379_v55  ;;  %v1467_v25 = vor.u32 %v1528_v24, %v1466_v23  ;;  %v1446_v27 = vld [vmem:[%s1849_s7 + $0xd8] sm:$0xf]  ;;  %v1523_v28 = vld [vmem:[%s1849_s7 + $0xe8] sm:$0xf0]  ;;  %v709_v30 = vld [vmem:[%s2607_s3] sm:$0xff] }
  0x6a   : > { %676 = vmatpush.bf16.msra.mxu3 %v1383_v59  ;;  %v373_v29 = vld [vmem:[%s2606_s2 + $0x18] sm:$0xff]  ;;  %v1447_v31 = vor.u32 %v1523_v28, %v1446_v27  ;;  %v1426_v32 = vld [vmem:[%s1849_s7 + $0xb0] sm:$0xf]  ;;  %v1518_v33 = vld [vmem:[%s1849_s7 + $0xc0] sm:$0xf0]  ;;  %715 = vperm.xlu2 %1573, %v709_v30  }
  0x6b   : > { %v1427_v34 = vor.u32 %v1518_v33, %v1426_v32  ;;  %v711_v35 = vld [vmem:[%s2607_s3 + $0x10] sm:$0xff]  ;;  %v1406_v36 = vld [vmem:[%s1849_s7 + $0x88] sm:$0xf]  ;;  %v1513_v37 = vld [vmem:[%s1849_s7 + $0x98] sm:$0xf0] }
  0x6c   : > { %620 = vmatpush.bf16.msra.mxu0 %v1351_v1  ;;  %v712_v38 = vld [vmem:[%s2607_s3 + $0x18] sm:$0xff]  ;;  %v710_v39 = vld [vmem:[%s2607_s3 + $0x8] sm:$0xff]  ;;  %v1407_v40 = vor.u32 %v1513_v37, %v1406_v36  ;;  %v1386_v42 = vld [vmem:[%s1849_s7 + $0x60] sm:$0xf] }
  0x6d   : > { %639 = vmatpush.bf16.msra.mxu1 %v1355_v4  ;;  %658 = vmatpush.bf16.msra.mxu2 %v1359_v5  ;;  %v1493_v41 = vld [vmem:[%s2604_s0 + $0x8] sm:$0xff]  ;;  %v1508_v43 = vld [vmem:[%s1849_s7 + $0x70] sm:$0xf0]  ;;  %v1366_v45 = vld [vmem:[%s1849_s7 + $0x38] sm:$0xf] }
  0x6e   : > { %677 = vmatpush.bf16.msra.mxu3 %v1363_v9  ;;  %v1387_v44 = vor.u32 %v1508_v43, %v1386_v42  ;;  %v1503_v46 = vld [vmem:[%s1849_s7 + $0x48] sm:$0xf0]  ;;  %v1346_v48 = vld [vmem:[%s1849_s7 + $0x10] sm:$0xf]  ;;  %v1498_v49 = vld [vmem:[%s1849_s7 + $0x20] sm:$0xf0] }
  0x6f   : > { %381 = vperm.xlu0 %1571, %v371_v26   ;;  %v1367_v47 = vor.u32 %v1503_v46, %v1366_v45  ;;  %v1347_v50 = vor.u32 %v1498_v49, %v1346_v48  ;;  %s1545_s7 = smul.u32 160, %s292_s5 }
  0x70   : > { %621 = vmatpush.bf16.msra.mxu0 %v1331_v16  ;;  %391 = vperm.xlu1 %1572, %v373_v29   ;;  %s1534_s5 = smul.u32 (%p1734_p5), 40, %s1282_s18 }
  0x71   : > { %640 = vmatpush.bf16.msra.mxu1 %v1335_v18  ;;  %659 = vmatpush.bf16.msra.mxu2 %v1339_v19  ;;  %s2254_s15 = scalar_lea.vmem [#allocation3], %s1545_s7 }
  0x72   : > { %678 = vmatpush.bf16.msra.mxu3 %v1343_v20  ;;  %720 = vperm.xlu2 %1573, %v710_v39   ;;  %s2554_s23 = scalar_lea.vmem (%p1734_p5), %s2608_s4, %s1534_s5 }
  0x73   : > { %622 = vmatmul.bf16.vlgmr.msra.gmra.mxu0 %v1492_v22 }
  0x74   : > { %690 = vmatpush.bf16.msrb.mxu0 %v1487_v21  ;;  %641 = vmatmul.bf16.vlgmr.msra.gmra.mxu1 %v1492_v22 }
  0x75   : > { %1535 = vmatpush.bf16.msrb.mxu1 %v1487_v21  ;;  %660 = vmatmul.bf16.vlgmr.msra.gmra.mxu2 %v1492_v22 }
  0x76   : > { %679 = vmatmul.bf16.vlgmr.msra.gmra.mxu3 %v1492_v22 }
  0x77   : > { %725 = vperm.xlu0 %1571, %v711_v35  }
  0x78   : > { %691 = vmatpush.bf16.msrb.mxu0 %v1467_v25  ;;  %730 = vperm.xlu1 %1572, %v712_v38  }
  0x79   : > { %1536 = vmatpush.bf16.msrb.mxu1 %v1467_v25 }
  0x7c   : > { %692 = vmatpush.bf16.msrb.mxu0 %v1447_v31 }
  0x7d   : > { %1537 = vmatpush.bf16.msrb.mxu1 %v1447_v31 }
  0x80   : > { %693 = vmatpush.bf16.msrb.mxu0 %v1427_v34 }
  0x81   : > { %1538 = vmatpush.bf16.msrb.mxu1 %v1427_v34 }
  0x83   : > { %627 = vmatmul.bf16.gmra.mxu0 %v1493_v41 }
  0x84   : > { %694 = vmatpush.bf16.msrb.mxu0 %v1407_v40  ;;  %646 = vmatmul.bf16.gmra.mxu1 %v1493_v41 }
  0x85   : > { %1539 = vmatpush.bf16.msrb.mxu1 %v1407_v40  ;;  %665 = vmatmul.bf16.gmra.mxu2 %v1493_v41 }
  0x86   : > { %684 = vmatmul.bf16.gmra.mxu3 %v1493_v41 }
  0x88   : > { %695 = vmatpush.bf16.msrb.mxu0 %v1387_v44 }
  0x89   : > { %1540 = vmatpush.bf16.msrb.mxu1 %v1387_v44 }
  0x8c   : > { %696 = vmatpush.bf16.msrb.mxu0 %v1367_v47 }
  0x8d   : > { %1541 = vmatpush.bf16.msrb.mxu1 %v1367_v47 }
  0x90   : > { %697 = vmatpush.bf16.msrb.mxu0 %v1347_v50 }
  0x91   : > { %1542 = vmatpush.bf16.msrb.mxu1 %v1347_v50 }
  0x93   : > { %698 = vmatmul.bf16.vlgmr.msrb.gmra.mxu0 %v1492_v22 }
  0x94   : > { %703 = vmatmul.bf16.vlgmr.msrb.gmra.mxu1 %v1493_v41 }
  0xd9   : > { %v1961_v51 = vpop.permute.xlu0 %376 }
  0xda   : > { %v1989_v12 = vpop.permute.xlu1 %386 }
  0xe1   : > { %v1971_v60 = vpop.permute.xlu0 %381 }
  0xe2   : > { %2635 = vst [vmem:[#allocation6_spill] sm:$0xff] %v1971_v60  ;;  %v2018_v38 = vpop.permute.xlu1 %391 }
  0xe3   : > { %2643 = vst [vmem:[#allocation14_spill] sm:$0xff] %v2018_v38 }
  0xf0   : > { %v623_v52 = vpop.f32.mrf.mxu0 }
  0xf1   : > { %v1964_v53 = vadd.f32 %v623_v52, %v1961_v51  ;;  %v642_v54 = vpop.f32.mrf.mxu1 }
  0xf2   : > { %v1967_v55 = vadd.f32 %v642_v54, %v1961_v51 }
  0xf3   : > { %2633 = vst [vmem:[#allocation4_spill] sm:$0xff] %v1964_v53  ;;  %v733_v56 = vsub.f32 0.0, %v1964_v53 }
  0xf4   : > { %2634 = vst [vmem:[#allocation5_spill] sm:$0xff] %v1967_v55  ;;  %v734_v57 = vsub.f32 0.0, %v1967_v55 }
  0xf5   : > { %v753_v58 = vmul.f32 1.442695, %v733_v56 }
  0xf6   : > { %v755_v59 = vmul.f32 1.442695, %v734_v57 }
  0xf7   : > { %1574 = vpow2.f32 %v753_v58 }
  0xf8   : > { %v661_v61 = vpop.f32.mrf.mxu2  ;;  %1576 = vpow2.f32 %v755_v59  ;;  %v625_v0 = vpop.f32.mrf.mxu0 }
  0xf9   : > { %v1974_v62 = vadd.f32 %v661_v61, %v1961_v51  ;;  %v680_v63 = vpop.f32.mrf.mxu3  ;;  %v1980_v2 = vadd.f32 %v625_v0, %v1971_v60  ;;  %v644_v3 = vpop.f32.mrf.mxu1 }
  0xfa   : > { %v1977_v1 = vadd.f32 %v680_v63, %v1961_v51  ;;  %v1984_v5 = vadd.f32 %v644_v3, %v1971_v60 }
  0xfb   : > { %2636 = vst [vmem:[#allocation7_spill] sm:$0xff] %v1974_v62  ;;  %v735_v4 = vsub.f32 0.0, %v1974_v62  ;;  %v738_v7 = vsub.f32 0.0, %v1980_v2 }
  0xfc   : > { %2637 = vst [vmem:[#allocation8_spill] sm:$0xff] %v1977_v1  ;;  %v736_v6 = vsub.f32 0.0, %v1977_v1  ;;  %v739_v9 = vsub.f32 0.0, %v1984_v5 }
  0xfd   : > { %2638 = vst [vmem:[#allocation9_spill] sm:$0xff] %v1980_v2  ;;  %v757_v8 = vmul.f32 1.442695, %v735_v4  ;;  %v1575_v10 = vpop.eup %1574  ;;  %v763_v14 = vmul.f32 1.442695, %v738_v7 }
  0xfe   : > { %2639 = vst [vmem:[#allocation10_spill] sm:$0xff] %v1984_v5  ;;  %v759_v11 = vmul.f32 1.442695, %v736_v6  ;;  %v1577_v13 = vpop.eup %1576  ;;  %v765_v15 = vmul.f32 1.442695, %v739_v9  ;;  %v1991_v17 = vadd.f32 1.0, %v1575_v10 }
  0xff   : > { %1578 = vpow2.f32 %v757_v8  ;;  %v1996_v21 = vadd.f32 1.0, %v1577_v13 }
 0x100   : > { %1580 = vpow2.f32 %v759_v11  ;;  %v663_v16 = vpop.f32.mrf.mxu2  ;;  %v628_v20 = vpop.f32.mrf.mxu0 }
 0x101   : > { %v1994_v18 = vadd.f32 %v663_v16, %v1971_v60  ;;  %v682_v19 = vpop.f32.mrf.mxu3  ;;  %v2002_v23 = vadd.f32 %v628_v20, %v1989_v12  ;;  %v647_v24 = vpop.f32.mrf.mxu1  ;;  %1582 = vpow2.f32 %v763_v14 }
 0x102   : > { %v1999_v22 = vadd.f32 %v682_v19, %v1971_v60  ;;  %v2006_v26 = vadd.f32 %v647_v24, %v1989_v12  ;;  %1584 = vpow2.f32 %v765_v15 }
 0x103   : > { %2640 = vst [vmem:[#allocation11_spill] sm:$0xff] %v1994_v18  ;;  %v740_v25 = vsub.f32 0.0, %v1994_v18  ;;  %v743_v28 = vsub.f32 0.0, %v2002_v23  ;;  %1586 = vrcp.f32 %v1991_v17 }
 0x104   : > { %2641 = vst [vmem:[#allocation12_spill] sm:$0xff] %v1999_v22  ;;  %v741_v27 = vsub.f32 0.0, %v1999_v22  ;;  %1588 = vrcp.f32 %v1996_v21  ;;  %v744_v34 = vsub.f32 0.0, %v2006_v26 }
 0x105   : > { %v1579_v29 = vpop.eup %1578  ;;  %v767_v30 = vmul.f32 1.442695, %v740_v25  ;;  %v773_v36 = vmul.f32 1.442695, %v743_v28 }
 0x106   : > { %v1581_v31 = vpop.eup %1580  ;;  %v2012_v32 = vadd.f32 1.0, %v1579_v29  ;;  %v769_v33 = vmul.f32 1.442695, %v741_v27  ;;  %v775_v45 = vmul.f32 1.442695, %v744_v34 }
 0x107   : > { %v2015_v35 = vadd.f32 1.0, %v1581_v31  ;;  %1590 = vpow2.f32 %v767_v30  ;;  %v1583_v39 = vpop.eup %1582 }
 0x108   : > { %1592 = vrcp.f32 %v2012_v32  ;;  %v666_v37 = vpop.f32.mrf.mxu2  ;;  %v630_v42 = vpop.f32.mrf.mxu0  ;;  %v2024_v44 = vadd.f32 1.0, %v1583_v39 }
 0x109   : > { %2642 = vst [vmem:[#allocation13_spill] sm:$0xff] %v2015_v35  ;;  %1594 = vrcp.f32 %v2015_v35  ;;  %v2022_v40 = vadd.f32 %v666_v37, %v1989_v12  ;;  %v685_v41 = vpop.f32.mrf.mxu3  ;;  %v1585_v43 = vpop.eup %1584  ;;  %v2038_v56 = vadd.f32 %v630_v42, %v2018_v38 }
 0x10a   : > { %2644 = vst [vmem:[#allocation15_spill] sm:$0xff] %v2024_v44  ;;  %1596 = vpow2.f32 %v769_v33  ;;  %v2027_v46 = vadd.f32 %v685_v41, %v1989_v12  ;;  %v649_v47 = vpop.f32.mrf.mxu1  ;;  %v2029_v48 = vpop.eup %1586  ;;  %v2034_v52 = vadd.f32 1.0, %v1585_v43 }
 0x10b   : > { %1598 = vpow2.f32 %v773_v36  ;;  %v745_v49 = vsub.f32 0.0, %v2022_v40  ;;  %v2032_v50 = vpop.eup %1588  ;;  %v2041_v57 = vadd.f32 %v649_v47, %v2018_v38  ;;  %v748_v0 = vsub.f32 0.0, %v2038_v56 }
 0x10c   : > { %2645 = vst [vmem:[#allocation16_spill] sm:$0xff] %v2034_v52  ;;  %v746_v54 = vsub.f32 0.0, %v2027_v46  ;;  %1600 = vrcp.f32 %v2024_v44  ;;  %v814_v8 = vmul.f32 %v2029_v48, %v1991_v17  ;;  %v2070_v28 = vmul.f32 %v2032_v50, %v1996_v21 }
 0x10d   : > { %v1591_v58 = vpop.eup %1590  ;;  %v777_v59 = vmul.f32 1.442695, %v745_v49  ;;  %1602 = vpow2.f32 %v775_v45  ;;  %v749_v6 = vsub.f32 0.0, %v2041_v57  ;;  %v783_v9 = vmul.f32 1.442695, %v748_v0 }
 0x10e   : > { %v2044_v61 = vpop.eup %1592  ;;  %v779_v63 = vmul.f32 1.442695, %v746_v54  ;;  %v2049_v4 = vadd.f32 1.0, %v1591_v58  ;;  %v815_v27 = vsub.f32 1.0, %v814_v8 }
 0x10f   : > { %v2047_v3 = vpop.eup %1594  ;;  %1604 = vpow2.f32 %v777_v59  ;;  %v785_v13 = vmul.f32 1.442695, %v749_v6  ;;  %v2076_v31 = vmul.f32 %v2044_v61, %v2012_v32 }
 0x110   : > { %v1597_v7 = vpop.eup %1596  ;;  %1606 = vrcp.f32 %v2034_v52  ;;  %v668_v10 = vpop.f32.mrf.mxu2  ;;  %v2085_v37 = vmul.f32 %v2047_v3, %v2015_v35 }
 0x111   : > { %v1599_v11 = vpop.eup %1598  ;;  %1608 = vpow2.f32 %v779_v63  ;;  %v687_v14 = vpop.f32.mrf.mxu3  ;;  %v2055_v15 = vadd.f32 1.0, %v1597_v7  ;;  %v2060_v19 = vadd.f32 %v668_v10, %v2018_v38  ;;  %v2105_v7 = vmul.f32 %v2029_v48, %v815_v27 }
 0x112   : > { %v2057_v16 = vadd.f32 1.0, %v1599_v11  ;;  %1610 = vpow2.f32 %v783_v9  ;;  %v2062_v20 = vpop.eup %1600  ;;  %v2066_v24 = vadd.f32 %v687_v14, %v2018_v38  ;;  %v699_v59 = vpop.f32.mrf.mxu0 }
 0x113   : > { %2646 = vst [vmem:[#allocation17_spill] sm:$0xff] %v2055_v15  ;;  %1612 = vrcp.f32 %v2049_v4  ;;  %v1603_v25 = vpop.eup %1602  ;;  %v750_v29 = vsub.f32 0.0, %v2060_v19  ;;  %v2116_v14 = vmul.f32 %v2062_v20, %v2024_v44  ;;  %v2121_v27 = vadd.f32 %v699_v59, %v1961_v51 }
 0x114   : > { %2647 = vst [vmem:[#allocation18_spill] sm:$0xff] %v2062_v20  ;;  %1614 = vrcp.f32 %v2057_v16  ;;  %v2078_v33 = vadd.f32 1.0, %v1603_v25  ;;  %v751_v34 = vsub.f32 0.0, %v2066_v24  ;;  %v972_v10 = vand.u32 2147483647, %v2057_v16 }
 0x115   : > { %v1605_v30 = vpop.eup %1604  ;;  %1616 = vpow2.f32 %v785_v13  ;;  %v787_v41 = vmul.f32 1.442695, %v750_v29  ;;  %v974_v11 = vand.u32 2147483648, %v2057_v16  ;;  %vm968_vm0 = vweird.f32 %v2057_v16 }
 0x116   : > { %v2081_v36 = vpop.eup %1606  ;;  %1618 = vrcp.f32 %v2055_v15  ;;  %v2088_v39 = vadd.f32 1.0, %v1605_v30  ;;  %v789_v47 = vmul.f32 1.442695, %v751_v34  ;;  %vm2141_vm1 = vcmp.eq.f32.partialorder %v972_v10, 8.507059e+37  ;;  %v2199_v15 = vpop.permute.xlu0 %725 }
 0x117   : > { %2648 = vst [vmem:[#allocation19_spill] sm:$0xff] %v2081_v36  ;;  %v1609_v42 = vpop.eup %1608  ;;  %1620 = vrcp.f32 %v2078_v33  ;;  %v2127_v30 = vmul.f32 %v2081_v36, %v2034_v52  ;;  %v975_v0 = vor.u32 1.1754944e-38, %v974_v11  ;;  %vm983_vm2 = vweird.f32 %v2078_v33 }
 0x118   : > { %v1611_v43 = vpop.eup %1610  ;;  %1622 = vrcp.f32 %v2088_v39  ;;  %v2092_v45 = vadd.f32 1.0, %v1609_v42  ;;  %v989_v54 = vand.u32 2147483648, %v2078_v33 }
 0x119   : > { %v2094_v49 = vpop.eup %1612  ;;  %v2097_v58 = vadd.f32 1.0, %v1611_v43  ;;  %1624 = vpow2.f32 %v787_v41  ;;  %2650 = vst [vmem:[#allocation21_spill] sm:$0xff] %v2127_v30 }
 0x11a   : > { %v2099_v63 = vpop.eup %1614  ;;  %1626 = vrcp.f32 %v2092_v45  ;;  %v990_v62 = vor.u32 1.1754944e-38, %v989_v54 }
 0x11b   : > { %v1617_v8 = vpop.eup %1616  ;;  %v964_v9 = vmul.f32 %v2099_v63, %v2057_v16  ;;  %1628 = vrcp.f32 %v2097_v58  ;;  %v1049_v41 = vand.u32 2147483648, %v2097_v58  ;;  %v1047_v51 = vand.u32 2147483647, %v2097_v58 }
 0x11c   : > { %v2112_v13 = vpop.eup %1618  ;;  %v2118_v25 = vadd.f32 1.0, %v1617_v8  ;;  %1630 = vpow2.f32 %v789_v47  ;;  %v987_v47 = vand.u32 2147483647, %v2078_v33  ;;  %vm1043_vm3 = vweird.f32 %v2097_v58 }
 0x11d   : > { %2649 = vst [vmem:[#allocation20_spill] sm:$0xff] %v2112_v13  ;;  %v2123_v29 = vpop.eup %1620  ;;  %v965_v34 = vsub.f32 1.0, %v964_v9  ;;  %v1050_v10 = vor.u32 1.1754944e-38, %v1049_v41  ;;  %vm969_vm4 = vweird.f32 %v2099_v63  ;;  %vm2163_vm5 = vcmp.eq.f32.partialorder %v1047_v51, 8.507059e+37 }
 0x11e   : > { %v2131_v42 = vpop.eup %1622  ;;  %v979_v43 = vmul.f32 %v2123_v29, %v2078_v33  ;;  %1632 = vrcp.f32 %v2118_v25  ;;  %v1064_v9 = vand.u32 2147483648, %v2118_v25  ;;  %v1062_v44 = vand.u32 2147483647, %v2118_v25  ;;  %vm970_vm13 = vmor %vm968_vm0, %vm969_vm4 }
 0x11f   : > { %v1625_v59 = vpop.eup %1624  ;;  %v994_v8 = vmul.f32 %v2131_v42, %v2088_v39  ;;  %v966_v2 = vmul.f32 %v2099_v63, %v965_v34  ;;  %vm984_vm6 = vweird.f32 %v2123_v29  ;;  %vm2168_vm7 = vcmp.eq.f32.partialorder %v987_v47, 8.507059e+37 }
 0x120   : > { %v2147_v22 = vpop.eup %1626  ;;  %v980_v18 = vsub.f32 1.0, %v979_v43  ;;  %v2149_v5 = vadd.f32 1.0, %v1625_v59  ;;  %v2161_v59 = vpop.permute.xlu1 %730  ;;  %vm1058_vm8 = vweird.f32 %v2118_v25  ;;  %v1065_v20 = vor.u32 1.1754944e-38, %v1064_v9  ;;  %vm2207_vm15 = vmor %vm983_vm2, %vm984_vm6 }
 0x121   : > { %v1629_v52 = vpop.eup %1628  ;;  %v995_v36 = vsub.f32 1.0, %v994_v8  ;;  %v2157_v1 = vmul.f32 %v2147_v22, %v2092_v45  ;;  %v967_v51 = vadd.f32 %v2099_v63, %v966_v2  ;;  %vm2181_vm10 = vcmp.eq.f32.partialorder %v1062_v44, 8.507059e+37 }
 0x122   : > { %v1631_v11 = vpop.eup %1630  ;;  %v1039_v43 = vmul.f32 %v1629_v52, %v2097_v58  ;;  %1634 = vrcp.f32 %v2149_v5  ;;  %v1079_v38 = vand.u32 2147483648, %v2149_v5  ;;  %v981_v60 = vmul.f32 %v2123_v29, %v980_v18 }
 0x123   : > { %v2172_v8 = vadd.f32 1.0, %v1631_v11  ;;  %v996_v30 = vmul.f32 %v2131_v42, %v995_v36  ;;  %vm1044_vm9 = vweird.f32 %v1629_v52  ;;  %v1077_v9 = vand.u32 2147483647, %v2149_v5 }
 0x124   : > { %v1633_v55 = vpop.eup %1632  ;;  %v1040_v53 = vsub.f32 1.0, %v1039_v43  ;;  %vm1116_vm11 = vcmp.gt.f32.partialorder %v2161_v59, 0.5  ;;  %v1010_v54 = vsub.f32 1.0, %v2157_v1  ;;  %v2188_v18 = vor.u32 1.1754944e-38, %v1079_v38  ;;  %vm1045_vm0 = vmor %vm1043_vm3, %vm1044_vm9 }
 0x125   : > { %v1054_v47 = vmul.f32 %v1633_v55, %v2118_v25  ;;  %1636 = vrcp.f32 %v2172_v8  ;;  %vm1059_vm12 = vweird.f32 %v1633_v55  ;;  %vm1073_vm14 = vweird.f32 %v2149_v5 }
 0x126   : > { %v1041_v2 = vmul.f32 %v1629_v52, %v1040_v53  ;;  %v1094_v44 = vand.u32 2147483648, %v2172_v8  ;;  %v971_v43 = vsel %vm970_vm13, %v2099_v63, %v967_v51  ;;  %v982_v13 = vadd.f32 %v2123_v29, %v981_v60  ;;  %vm1060_vm6 = vmor %vm1058_vm8, %vm1059_vm12 }
 0x127   : > { %v1055_v36 = vsub.f32 1.0, %v1054_v47  ;;  %v1092_v38 = vand.u32 2147483647, %v2172_v8  ;;  %v976_v16 = vsel %vm2141_vm1, %v975_v0, %v971_v43  ;;  %v997_v63 = vadd.f32 %v2131_v42, %v996_v30 }
 0x128   : > { %v1635_v1 = vpop.eup %1634  ;;  %v1042_v53 = vadd.f32 %v1629_v52, %v1041_v2  ;;  %vm2216_vm13 = vcmp.eq.f32.partialorder %v1077_v9, 8.507059e+37  ;;  %vm1088_vm1 = vweird.f32 %v2172_v8  ;;  %v1095_v33 = vor.u32 1.1754944e-38, %v1094_v44 }
 0x129   : > { %v1069_v60 = vmul.f32 %v1635_v1, %v2149_v5  ;;  %v1056_v51 = vmul.f32 %v1633_v55, %v1055_v36  ;;  %vm1074_vm4 = vweird.f32 %v1635_v1  ;;  %v977_v2 = vmul.f32 2.0, %v976_v16 }
 0x12a   : > { %v1046_v6 = vsel %vm1045_vm0, %v1629_v52, %v1042_v53  ;;  %v986_v30 = vsel %vm2207_vm15, %v2123_v29, %v982_v13  ;;  %vm998_vm2 = vweird.f32 %v2088_v39  ;;  %vm1115_vm3 = vcmp.gt.f32.partialorder %v2199_v15, 0.5  ;;  %vm1075_vm12 = vmor %vm1073_vm14, %vm1074_vm4 }
 0x12b   : > { %v1637_v58 = vpop.eup %1636  ;;  %v1070_v36 = vsub.f32 1.0, %v1069_v60  ;;  %v1051_v9 = vsel %vm2163_vm5, %v1050_v10, %v1046_v6  ;;  %v1057_v43 = vadd.f32 %v1633_v55, %v1056_v51  ;;  %v991_v35 = vsel %vm2168_vm7, %v990_v62, %v986_v30 }
 0x12c   : > { %v1084_v52 = vmul.f32 %v1637_v58, %v2172_v8  ;;  %v1052_v44 = vmul.f32 2.0, %v1051_v9  ;;  %vm1089_vm9 = vweird.f32 %v1637_v58  ;;  %vm2236_vm15 = vcmp.eq.f32.partialorder %v1092_v38, 8.507059e+37  ;;  %v704_v8 = vpop.f32.mrf.mxu1 }
 0x12d   : > { %v992_v29 = vmul.f32 2.0, %v991_v35  ;;  %v1061_v10 = vsel %vm1060_vm6, %v1633_v55, %v1057_v43  ;;  %v1071_v34 = vmul.f32 %v1635_v1, %v1070_v36  ;;  %vm999_vm5 = vweird.f32 %v2131_v42  ;;  %vm1090_vm14 = vmor %vm1088_vm1, %vm1089_vm9 }
 0x12e   : > { %v1002_v62 = vand.u32 2147483647, %v2088_v39  ;;  %v1085_v41 = vsub.f32 1.0, %v1084_v52  ;;  %v1066_v53 = vsel %vm2181_vm10, %v1065_v20, %v1061_v10  ;;  %v1132_v25 = vsel %vm1116_vm11, %v1052_v44, %v2038_v56  ;;  %vm2249_vm7 = vmor %vm998_vm2, %vm999_vm5  ;;  %v2687_v10 = vld [vmem:[#allocation4_spill] sm:$0xff] }
 0x12f   : > { %v1004_v55 = vand.u32 2147483648, %v2088_v39  ;;  %v1067_v35 = vmul.f32 2.0, %v1066_v53  ;;  %v1072_v16 = vadd.f32 %v1635_v1, %v1071_v34  ;;  %1152 = vst [vmem:[%s2254_s15 + $0x78] sm:$0xff] %v1132_v25  ;;  %v1001_v20 = vsel %vm2249_vm7, %v2131_v42, %v997_v63 }
 0x130   : > { %vm1003_vm8 = vcmp.eq.f32.partialorder %v1002_v62, 8.507059e+37  ;;  %vm818_vm10 = vweird.f32 %v1991_v17  ;;  %v1086_v56 = vmul.f32 %v1637_v58, %v1085_v41  ;;  %v1011_v11 = vmul.f32 %v2147_v22, %v1010_v54 }
 0x131   : > { %v1005_v39 = vor.u32 1.1754944e-38, %v1004_v55  ;;  %vm1013_vm0 = vweird.f32 %v2092_v45  ;;  %v1076_v47 = vsel %vm1075_vm12, %v1635_v1, %v1072_v16  ;;  %v1133_v60 = vsel %vm1116_vm11, %v1067_v35, %v2041_v57 }
 0x132   : > { %vm1014_vm2 = vweird.f32 %v2147_v22  ;;  %v1017_v42 = vand.u32 2147483647, %v2092_v45  ;;  %v1081_v5 = vsel %vm2216_vm13, %v2188_v18, %v1076_v47  ;;  %v1087_v63 = vadd.f32 %v1637_v58, %v1086_v56  ;;  %1153 = vst [vmem:[%s2254_s15 + $0x80] sm:$0xff] %v1133_v60 }
 0x133   : > { %v1006_v54 = vsel %vm1003_vm8, %v1005_v39, %v1001_v20  ;;  %v1012_v1 = vadd.f32 %v2147_v22, %v1011_v11  ;;  %v1082_v51 = vmul.f32 2.0, %v1081_v5  ;;  %vm2279_vm4 = vmor %vm1013_vm0, %vm1014_vm2  ;;  %v1019_v18 = vand.u32 2147483648, %v2092_v45 }
 0x134   : > { %v1007_v57 = vmul.f32 2.0, %v1006_v54  ;;  %vm2283_vm6 = vcmp.eq.f32.partialorder %v1017_v42, 8.507059e+37  ;;  %v1091_v30 = vsel %vm1090_vm14, %v1637_v58, %v1087_v63  ;;  %v1127_v9 = vsel %vm1115_vm3, %v977_v2, %v2002_v23  ;;  %v2680_v42 = vld [vmem:[#allocation13_spill] sm:$0xff]  ;;  %v2682_v54 = vld [vmem:[#allocation20_spill] sm:$0xff] }
 0x135   : > { %v1016_v36 = vsel %vm2279_vm4, %v2147_v22, %v1012_v1  ;;  %v1128_v43 = vsel %vm1115_vm3, %v992_v29, %v2006_v26  ;;  %v1096_v52 = vsel %vm2236_vm15, %v1095_v33, %v1091_v30  ;;  %v1134_v45 = vsel %vm1116_vm11, %v1082_v51, %v2060_v19  ;;  %1147 = vst [vmem:[%s2254_s15 + $0x50] sm:$0xff] %v1127_v9  ;;  %v2681_v63 = vld [vmem:[#allocation17_spill] sm:$0xff]  ;;  %v2379_v51 = vpop.permute.xlu2 %715 }
 0x136   : > { %v1020_v58 = vor.u32 1.1754944e-38, %v1019_v18  ;;  %v1129_v22 = vsel %vm1115_vm3, %v1007_v57, %v2022_v40  ;;  %v1097_v44 = vmul.f32 2.0, %v1096_v52  ;;  %1154 = vst [vmem:[%s2254_s15 + $0x88] sm:$0xff] %v1134_v45  ;;  %v737_v23 = vsub.f32 0.0, %v2121_v27 }
 0x137   : > { %v2309_v26 = vadd.f32 %v704_v8, %v1989_v12  ;;  %v817_v33 = vadd.f32 %v2029_v48, %v2105_v7  ;;  %1148 = vst [vmem:[%s2254_s15 + $0x58] sm:$0xff] %v1128_v43  ;;  %vm819_vm13 = vweird.f32 %v2029_v48  ;;  %v822_v40 = vand.u32 2147483647, %v1991_v17  ;;  %v701_v8 = vpop.f32.mrf.mxu0 }
 0x138   : > { %v1021_v19 = vsel %vm2283_vm6, %v1020_v58, %v1016_v36  ;;  %v824_v2 = vand.u32 2147483648, %v1991_v17  ;;  %v1135_v13 = vsel %vm1116_vm11, %v1097_v44, %v2066_v24  ;;  %1149 = vst [vmem:[%s2254_s15 + $0x60] sm:$0xff] %v1129_v22  ;;  %v761_v29 = vmul.f32 1.442695, %v737_v23  ;;  %vm2326_vm1 = vmor %vm818_vm10, %vm819_vm13  ;;  %v2685_v22 = vld [vmem:[#allocation21_spill] sm:$0xff] }
 0x139   : > { %v1022_v12 = vmul.f32 2.0, %v1021_v19  ;;  %v747_v7 = vsub.f32 0.0, %v2309_v26  ;;  %v890_v34 = vsub.f32 1.0, %v2116_v14  ;;  %v2333_v62 = vmul.f32 %v2094_v49, %v2049_v4  ;;  %1155 = vst [vmem:[%s2254_s15 + $0x90] sm:$0xff] %v1135_v13  ;;  %v2686_v19 = vld [vmem:[#allocation6_spill] sm:$0xff] }
 0x13a   : > { %v821_v24 = vsel %vm2326_vm1, %v2029_v48, %v817_v33  ;;  %v2673_v41 = vsub.f32 1.0, %v2070_v28  ;;  %1638 = vpow2.f32 %v761_v29  ;;  %v825_v38 = vor.u32 1.1754944e-38, %v824_v2 }
 0x13b   : > { %v1130_v17 = vsel %vm1115_vm3, %v1022_v12, %v2027_v46  ;;  %v781_v25 = vmul.f32 1.442695, %v747_v7  ;;  %vm833_vm9 = vweird.f32 %v1996_v21  ;;  %vm834_vm15 = vweird.f32 %v2032_v50  ;;  %v706_v12 = vpop.f32.mrf.mxu1 }
 0x13c   : > { %v831_v53 = vmul.f32 %v2032_v50, %v2673_v41  ;;  %1150 = vst [vmem:[%s2254_s15 + $0x68] sm:$0xff] %v1130_v17  ;;  %v837_v48 = vand.u32 2147483647, %v1996_v21  ;;  %vm823_vm5 = vcmp.eq.f32.partialorder %v822_v40, 8.507059e+37  ;;  %vm2350_vm7 = vmor %vm833_vm9, %vm834_vm15  ;;  %v839_v46 = vand.u32 2147483648, %v1996_v21 }
 0x13d   : > { %1640 = vpow2.f32 %v781_v25  ;;  %v2676_v35 = vsub.f32 1.0, %v2076_v31  ;;  %v826_v20 = vsel %vm823_vm5, %v825_v38, %v821_v24  ;;  %vm848_vm8 = vweird.f32 %v2012_v32  ;;  %v2688_v25 = vld [vmem:[#allocation5_spill] sm:$0xff] }
 0x13e   : > { %v832_v55 = vadd.f32 %v2032_v50, %v831_v53  ;;  %vm849_vm10 = vweird.f32 %v2044_v61  ;;  %v840_v39 = vor.u32 1.1754944e-38, %v839_v46  ;;  %v852_v47 = vand.u32 2147483647, %v2012_v32  ;;  %v2690_v46 = vld [vmem:[#allocation14_spill] sm:$0xff] }
 0x13f   : > { %v846_v16 = vmul.f32 %v2044_v61, %v2676_v35  ;;  %v854_v21 = vand.u32 2147483648, %v2012_v32  ;;  %vm838_vm12 = vcmp.eq.f32.partialorder %v837_v48, 8.507059e+37  ;;  %vm2366_vm0 = vmor %vm848_vm8, %vm849_vm10  ;;  %v2679_v60 = vsub.f32 1.0, %v2085_v37 }
 0x140   : > { %v836_v56 = vsel %vm2350_vm7, %v2032_v50, %v832_v55  ;;  %vm863_vm2 = vweird.f32 %v2680_v42  ;;  %vm864_vm14 = vweird.f32 %v2047_v3  ;;  %v1639_v5 = vpop.eup %1638  ;;  %v2377_v1 = vmul.f32 %v2682_v54, %v2681_v63  ;;  %v2689_v55 = vld [vmem:[#allocation7_spill] sm:$0xff] }
 0x141   : > { %v847_v11 = vadd.f32 %v2044_v61, %v846_v16  ;;  %v861_v50 = vmul.f32 %v2047_v3, %v2679_v60  ;;  %v841_v32 = vsel %vm838_vm12, %v840_v39, %v836_v56  ;;  %v855_v6 = vor.u32 1.1754944e-38, %v854_v21  ;;  %vm2392_vm6 = vmor %vm863_vm2, %vm864_vm14  ;;  %v2691_v16 = vld [vmem:[#allocation18_spill] sm:$0xff] }
 0x142   : > { %v2384_v37 = vadd.f32 1.0, %v1639_v5  ;;  %vm853_vm4 = vcmp.eq.f32.partialorder %v852_v47, 8.507059e+37  ;;  %v867_v18 = vand.u32 2147483647, %v2680_v42  ;;  %v827_v36 = vmul.f32 2.0, %v826_v20  ;;  %v2695_v5 = vld [vmem:[#allocation15_spill] sm:$0xff] }
 0x143   : > { %v851_v57 = vsel %vm2366_vm0, %v2044_v61, %v847_v11  ;;  %v862_v0 = vadd.f32 %v2047_v3, %v861_v50  ;;  %v1641_v30 = vpop.eup %1640  ;;  %v842_v9 = vmul.f32 2.0, %v841_v32  ;;  %v869_v61 = vand.u32 2147483648, %v2680_v42  ;;  %v2692_v11 = vld [vmem:[#allocation8_spill] sm:$0xff] }
 0x144   : > { %v856_v43 = vsel %vm853_vm4, %v855_v6, %v851_v57  ;;  %1642 = vrcp.f32 %v2384_v37  ;;  %v2398_v45 = vadd.f32 1.0, %v1641_v30  ;;  %vm1113_vm13 = vcmp.gt.f32.partialorder %v2379_v51, 0.5  ;;  %v2696_v57 = vld [vmem:[#allocation19_spill] sm:$0xff]  ;;  %v721_v51 = vpop.permute.xlu2 %720 }
 0x145   : > { %v866_v58 = vsel %vm2392_vm6, %v2047_v3, %v862_v0  ;;  %v905_v44 = vsub.f32 1.0, %v2685_v22  ;;  %v857_v23 = vmul.f32 2.0, %v856_v43  ;;  %v870_v33 = vor.u32 1.1754944e-38, %v869_v61 }
 0x146   : > { %v2406_v40 = vadd.f32 %v701_v8, %v2686_v19  ;;  %v920_v2 = vsub.f32 1.0, %v2333_v62  ;;  %1644 = vrcp.f32 %v2398_v45  ;;  %vm868_vm1 = vcmp.eq.f32.partialorder %v867_v18, 8.507059e+37 }
 0x147   : > { %v884_v13 = vand.u32 2147483648, %v2384_v37  ;;  %v1034_v3 = vand.u32 2147483648, %v2398_v45  ;;  %v871_v29 = vsel %vm868_vm1, %v870_v33, %v866_v58  ;;  %v882_v7 = vand.u32 2147483647, %v2384_v37 }
 0x148   : > { %v1117_v24 = vsel %vm1113_vm13, %v827_v36, %v2687_v10  ;;  %v935_v41 = vsub.f32 1.0, %v2377_v1  ;;  %v1032_v53 = vand.u32 2147483647, %v2398_v45  ;;  %v872_v17 = vmul.f32 2.0, %v871_v29 }
 0x149   : > { %v1118_v38 = vsel %vm1113_vm13, %v842_v9, %v2688_v25  ;;  %1137 = vst [vmem:[%s2254_s15] sm:$0xff] %v1117_v24  ;;  %v1119_v48 = vsel %vm1113_vm13, %v857_v23, %v2689_v55  ;;  %v742_v28 = vsub.f32 0.0, %v2406_v40  ;;  %v2428_v35 = vadd.f32 %v706_v12, %v2690_v46 }
 0x14a   : > { %1138 = vst [vmem:[%s2254_s15 + $0x8] sm:$0xff] %v1118_v38  ;;  %v891_v20 = vmul.f32 %v2691_v16, %v890_v34  ;;  %v1643_v56 = vpop.eup %1642  ;;  %vm878_vm9 = vweird.f32 %v2384_v37  ;;  %v885_v39 = vor.u32 1.1754944e-38, %v884_v13  ;;  %v1120_v47 = vsel %vm1113_vm13, %v872_v17, %v2692_v11 }
 0x14b   : > { %1139 = vst [vmem:[%s2254_s15 + $0x10] sm:$0xff] %v1119_v48  ;;  %vm894_vm15 = vweird.f32 %v2691_v16  ;;  %v874_v21 = vmul.f32 %v1643_v56, %v2384_v37  ;;  %vm1028_vm5 = vweird.f32 %v2398_v45  ;;  %v1035_v31 = vor.u32 1.1754944e-38, %v1034_v3 }
 0x14c   : > { %vm2441_vm7 = vcmp.eq.f32.partialorder %v882_v7, 8.507059e+37  ;;  %1140 = vst [vmem:[%s2254_s15 + $0x18] sm:$0xff] %v1120_v47  ;;  %v771_v34 = vmul.f32 1.442695, %v742_v28  ;;  %v752_v60 = vsub.f32 0.0, %v2428_v35  ;;  %v1645_v50 = vpop.eup %1644  ;;  %v892_v42 = vadd.f32 %v2691_v16, %v891_v20 }
 0x14d   : > { %vm893_vm8 = vweird.f32 %v2695_v5  ;;  %v899_v32 = vand.u32 2147483648, %v2695_v5  ;;  %v906_v6 = vmul.f32 %v2696_v57, %v905_v44  ;;  %v875_v0 = vsub.f32 1.0, %v874_v21  ;;  %v2701_v44 = vld [vmem:[#allocation16_spill] sm:$0xff] }
 0x14e   : > { %v1024_v18 = vmul.f32 %v1645_v50, %v2398_v45  ;;  %vm2452_vm10 = vcmp.eq.f32.partialorder %v1032_v53, 8.507059e+37  ;;  %1646 = vpow2.f32 %v771_v34  ;;  %vm2458_vm12 = vmor %vm893_vm8, %vm894_vm15  ;;  %v897_v36 = vand.u32 2147483647, %v2695_v5 }
 0x14f   : > { %vm879_vm0 = vweird.f32 %v1643_v56  ;;  %v791_v9 = vmul.f32 1.442695, %v752_v60  ;;  %v896_v43 = vsel %vm2458_vm12, %v2691_v16, %v892_v42  ;;  %v907_v52 = vadd.f32 %v2696_v57, %v906_v6  ;;  %v2706_v42 = vld [vmem:[#allocation9_spill] sm:$0xff] }
 0x150   : > { %v1025_v61 = vsub.f32 1.0, %v1024_v18  ;;  %v876_v58 = vmul.f32 %v1643_v56, %v875_v0  ;;  %v900_v22 = vor.u32 1.1754944e-38, %v899_v32  ;;  %vm909_vm2 = vweird.f32 %v2696_v57  ;;  %vm880_vm15 = vmor %vm878_vm9, %vm879_vm0  ;;  %v2707_v32 = vld [vmem:[#allocation10_spill] sm:$0xff] }
 0x151   : > { %1648 = vpow2.f32 %v791_v9  ;;  %vm908_vm14 = vweird.f32 %v2701_v44  ;;  %v912_v23 = vand.u32 2147483647, %v2701_v44  ;;  %v914_v33 = vand.u32 2147483648, %v2701_v44 }
 0x152   : > { %v1026_v19 = vmul.f32 %v1645_v50, %v1025_v61  ;;  %vm1029_vm4 = vweird.f32 %v1645_v50  ;;  %v877_v13 = vadd.f32 %v1643_v56, %v876_v58  ;;  %vm898_vm6 = vcmp.eq.f32.partialorder %v897_v36, 8.507059e+37  ;;  %vm2471_vm1 = vmor %vm908_vm14, %vm909_vm2  ;;  %v2709_v61 = vld [vmem:[#allocation12_spill] sm:$0xff]  ;;  %v1183_v59 = vld [vmem:[%s2254_s15 + $0x10] sm:$0xff] (%p1734_p5) }
 0x153   : > { %v901_v3 = vsel %vm898_vm6, %v900_v22, %v896_v43  ;;  %v911_v29 = vsel %vm2471_vm1, %v2696_v57, %v907_v52  ;;  %vm913_vm8 = vcmp.eq.f32.partialorder %v912_v23, 8.507059e+37  ;;  %v921_v7 = vmul.f32 %v2094_v49, %v920_v2  ;;  %vm1030_vm2 = vmor %vm1028_vm5, %vm1029_vm4  ;;  %1184 = vst [vmem:[%s2554_s23 + $0x10] sm:$0xff] (%p1734_p5), %v1183_v59 }
 0x154   : > { %v1647_v10 = vpop.eup %1646  ;;  %v1027_v24 = vadd.f32 %v1645_v50, %v1026_v19  ;;  %v881_v53 = vsel %vm880_vm15, %v1643_v56, %v877_v13  ;;  %v915_v17 = vor.u32 1.1754944e-38, %v914_v33  ;;  %vm924_vm12 = vweird.f32 %v2094_v49 }
 0x155   : > { %v886_v37 = vsel %vm2441_vm7, %v885_v39, %v881_v53  ;;  %v2489_v25 = vadd.f32 1.0, %v1647_v10  ;;  %v922_v38 = vadd.f32 %v2094_v49, %v921_v7  ;;  %vm923_vm9 = vweird.f32 %v2049_v4 }
 0x156   : > { %v1031_v62 = vsel %vm1030_vm2, %v1645_v50, %v1027_v24  ;;  %v887_v2 = vmul.f32 2.0, %v886_v37  ;;  %v916_v55 = vsel %vm913_vm8, %v915_v17, %v911_v29  ;;  %vm2493_vm0 = vmor %vm923_vm9, %vm924_vm12  ;;  %v927_v45 = vand.u32 2147483647, %v2049_v4 }
 0x157   : > { %v1649_v28 = vpop.eup %1648  ;;  %v1036_v46 = vsel %vm2452_vm10, %v1035_v31, %v1031_v62  ;;  %1650 = vrcp.f32 %v2489_v25  ;;  %v926_v16 = vsel %vm2493_vm0, %v2094_v49, %v922_v38  ;;  %v929_v20 = vand.u32 2147483648, %v2049_v4 }
 0x158   : > { %v1037_v56 = vmul.f32 2.0, %v1036_v46  ;;  %v1121_v39 = vsel %vm1113_vm13, %v887_v2, %v2121_v27  ;;  %v812_v11 = vadd.f32 1.0, %v1649_v28  ;;  %v936_v47 = vmul.f32 %v2682_v54, %v935_v41  ;;  %v1199_v28 = vld [vmem:[%s2254_s15 + $0x50] sm:$0xff] (%p1734_p5)  ;;  %v1201_v46 = vld [vmem:[%s2254_s15 + $0x58] sm:$0xff] (%p1734_p5) }
 0x159   : > { %1141 = vst [vmem:[%s2254_s15 + $0x20] sm:$0xff] %v1121_v39  ;;  %v902_v21 = vmul.f32 2.0, %v901_v3  ;;  %v930_v31 = vor.u32 1.1754944e-38, %v929_v20  ;;  %vm939_vm5 = vweird.f32 %v2682_v54  ;;  %v917_v4 = vmul.f32 2.0, %v916_v55  ;;  %v1205_v20 = vld [vmem:[%s2254_s15 + $0x68] sm:$0xff] (%p1734_p5)  ;;  %v1209_v39 = vld [vmem:[%s2254_s15 + $0x78] sm:$0xff] (%p1734_p5) }
 0x15a   : > { %v1131_v49 = vsel %vm1115_vm3, %v1037_v56, %v2309_v26  ;;  %1652 = vrcp.f32 %v812_v11  ;;  %vm928_vm7 = vcmp.eq.f32.partialorder %v927_v45, 8.507059e+37  ;;  %v937_v14 = vadd.f32 %v2682_v54, %v936_v47  ;;  %1200 = vst [vmem:[%s2554_s23 + $0xa0] sm:$0xff] (%p1734_p5), %v1199_v28  ;;  %v1213_v47 = vld [vmem:[%s2254_s15 + $0x88] sm:$0xff] (%p1734_p5) }
 0x15b   : > { %1151 = vst [vmem:[%s2254_s15 + $0x70] sm:$0xff] %v1131_v49  ;;  %v931_v27 = vsel %vm928_vm7, %v930_v31, %v926_v16  ;;  %vm938_vm13 = vweird.f32 %v2681_v63  ;;  %v942_v1 = vand.u32 2147483647, %v2681_v63  ;;  %v944_v34 = vand.u32 2147483648, %v2681_v63  ;;  %v2708_v63 = vld [vmem:[#allocation11_spill] sm:$0xff]  ;;  %v1203_v16 = vld [vmem:[%s2254_s15 + $0x60] sm:$0xff] (%p1734_p5) }
 0x15c   : > { %v932_v41 = vmul.f32 2.0, %v931_v27  ;;  %vm940_vm10 = vmor %vm938_vm13, %vm939_vm5  ;;  %vm1114_vm3 = vcmp.gt.f32.partialorder %v721_v51, 0.5  ;;  %v959_v36 = vand.u32 2147483648, %v2489_v25  ;;  %v957_v43 = vand.u32 2147483647, %v2489_v25  ;;  %1202 = vst [vmem:[%s2554_s23 + $0xa8] sm:$0xff] (%p1734_p5), %v1201_v46 }
 0x15d   : > { %v1651_v60 = vpop.eup %1650  ;;  %v941_v15 = vsel %vm940_vm10, %v2682_v54, %v937_v14  ;;  %v945_v50 = vor.u32 1.1754944e-38, %v944_v34  ;;  %vm943_vm14 = vcmp.eq.f32.partialorder %v942_v1, 8.507059e+37  ;;  %v1122_v5 = vsel %vm1114_vm3, %v902_v21, %v2706_v42  ;;  %1204 = vst [vmem:[%s2554_s23 + $0xb0] sm:$0xff] (%p1734_p5), %v1203_v16  ;;  %v1215_v21 = vld [vmem:[%s2254_s15 + $0x90] sm:$0xff] (%p1734_p5) }
 0x15e   : > { %v949_v26 = vmul.f32 %v1651_v60, %v2489_v25  ;;  %v1123_v57 = vsel %vm1114_vm3, %v917_v4, %v2707_v32  ;;  %v1124_v8 = vsel %vm1114_vm3, %v932_v41, %v2708_v63  ;;  %1142 = vst [vmem:[%s2254_s15 + $0x28] sm:$0xff] %v1122_v5  ;;  %vm954_vm4 = vweird.f32 %v1651_v60 }
 0x15f   : > { %v946_v18 = vsel %vm943_vm14, %v945_v50, %v941_v15  ;;  %1143 = vst [vmem:[%s2254_s15 + $0x30] sm:$0xff] %v1123_v57  ;;  %v1109_v22 = vand.u32 2147483648, %v812_v11  ;;  %vm953_vm6 = vweird.f32 %v2489_v25  ;;  %v1107_v33 = vand.u32 2147483647, %v812_v11  ;;  %v1181_v25 = vld [vmem:[%s2254_s15 + $0x8] sm:$0xff] (%p1734_p5) }
 0x160   : > { %v1653_v6 = vpop.eup %1652  ;;  %v950_v0 = vsub.f32 1.0, %v949_v26  ;;  %v947_v30 = vmul.f32 2.0, %v946_v18  ;;  %1144 = vst [vmem:[%s2254_s15 + $0x38] sm:$0xff] %v1124_v8  ;;  %vm955_vm15 = vmor %vm953_vm6, %vm954_vm4  ;;  %v960_v19 = vor.u32 1.1754944e-38, %v959_v36  ;;  %vm958_vm8 = vcmp.eq.f32.partialorder %v957_v43, 8.507059e+37  ;;  %v1187_v38 = vld [vmem:[%s2254_s15 + $0x20] sm:$0xff] (%p1734_p5) }
 0x161   : > { %v1099_v54 = vmul.f32 %v1653_v6, %v812_v11  ;;  %vm1104_vm1 = vweird.f32 %v1653_v6  ;;  %vm1103_vm12 = vweird.f32 %v812_v11  ;;  %v1110_v29 = vor.u32 1.1754944e-38, %v1109_v22  ;;  %1182 = vst [vmem:[%s2554_s23 + $0x8] sm:$0xff] (%p1734_p5), %v1181_v25  ;;  %v1211_v11 = vld [vmem:[%s2254_s15 + $0x80] sm:$0xff] (%p1734_p5) }
 0x162   : > { %v951_v9 = vmul.f32 %v1651_v60, %v950_v0  ;;  %v1125_v58 = vsel %vm1114_vm3, %v947_v30, %v2709_v61  ;;  %vm1105_vm2 = vmor %vm1103_vm12, %vm1104_vm1  ;;  %vm1108_vm9 = vcmp.eq.f32.partialorder %v1107_v33, 8.507059e+37  ;;  %1188 = vst [vmem:[%s2554_s23 + $0x20] sm:$0xff] (%p1734_p5), %v1187_v38  ;;  %v1207_v56 = vld [vmem:[%s2254_s15 + $0x70] sm:$0xff] (%p1734_p5) }
 0x163   : > { %v1100_v52 = vsub.f32 1.0, %v1099_v54  ;;  %1145 = vst [vmem:[%s2254_s15 + $0x40] sm:$0xff] %v1125_v58 }
 0x164   : > { %v952_v44 = vadd.f32 %v1651_v60, %v951_v9  ;;  %1206 = vst [vmem:[%s2554_s23 + $0xb8] sm:$0xff] (%p1734_p5), %v1205_v20 }
 0x165   : > { %v1101_v23 = vmul.f32 %v1653_v6, %v1100_v52  ;;  %v1189_v62 = vld [vmem:[%s2254_s15 + $0x28] sm:$0xff] (%p1734_p5)  ;;  %1208 = vst [vmem:[%s2554_s23 + $0xc0] sm:$0xff] (%p1734_p5), %v1207_v56 }
 0x166   : > { %v956_v13 = vsel %vm955_vm15, %v1651_v60, %v952_v44  ;;  %v1191_v2 = vld [vmem:[%s2254_s15 + $0x30] sm:$0xff] (%p1734_p5)  ;;  %1190 = vst [vmem:[%s2554_s23 + $0x50] sm:$0xff] (%p1734_p5), %v1189_v62 }
 0x167   : > { %v1102_v12 = vadd.f32 %v1653_v6, %v1101_v23  ;;  %v961_v3 = vsel %vm958_vm8, %v960_v19, %v956_v13  ;;  %v1193_v55 = vld [vmem:[%s2254_s15 + $0x38] sm:$0xff] (%p1734_p5)  ;;  %1192 = vst [vmem:[%s2554_s23 + $0x58] sm:$0xff] (%p1734_p5), %v1191_v2 }
 0x168   : > { %v962_v7 = vmul.f32 2.0, %v961_v3  ;;  %1194 = vst [vmem:[%s2554_s23 + $0x60] sm:$0xff] (%p1734_p5), %v1193_v55 }
 0x169   : > { %v1106_v10 = vsel %vm1105_vm2, %v1653_v6, %v1102_v12  ;;  %1210 = vst [vmem:[%s2554_s23 + $0xf0] sm:$0xff] (%p1734_p5), %v1209_v39 }
 0x16a   : > { %v1111_v24 = vsel %vm1108_vm9, %v1110_v29, %v1106_v10  ;;  %v1126_v53 = vsel %vm1114_vm3, %v962_v7, %v2406_v40  ;;  %1163 = sbr.rel (!%p1734_p5) target bundleno = 375 (0x177), region = 66  ;;  %v1179_v40 = vld [vmem:[%s2254_s15] sm:$0xff] (%p1734_p5)  ;;  %1212 = vst [vmem:[%s2554_s23 + $0xf8] sm:$0xff] (%p1734_p5), %v1211_v11 }
 0x16b   : > { %v1112_v17 = vmul.f32 2.0, %v1111_v24  ;;  %1146 = vst [vmem:[%s2254_s15 + $0x48] sm:$0xff] %v1126_v53  ;;  %v1195_v48 = vld [vmem:[%s2254_s15 + $0x40] sm:$0xff] (%p1734_p5) }
 0x16c   : > { %1180 = vst [vmem:[%s2554_s23] sm:$0xff] (%p1734_p5), %v1179_v40 }
 0x16d   : > { %v1136_v37 = vsel %vm1116_vm11, %v1112_v17, %v2428_v35  ;;  %v1185_v35 = vld [vmem:[%s2254_s15 + $0x18] sm:$0xff] (%p1734_p5)  ;;  %1196 = vst [vmem:[%s2554_s23 + $0x68] sm:$0xff] (%p1734_p5), %v1195_v48 }
 0x16e   : > { %1156 = vst [vmem:[%s2254_s15 + $0x98] sm:$0xff] %v1136_v37 }
 0x16f   : > { %1186 = vst [vmem:[%s2554_s23 + $0x18] sm:$0xff] %v1185_v35 }
 0x170   : > { %1214 = vst [vmem:[%s2554_s23 + $0x100] sm:$0xff] %v1213_v47 }
 0x171   : > { %1216 = vst [vmem:[%s2554_s23 + $0x108] sm:$0xff] %v1215_v21 }
 0x172   : > { %v1197_v45 = vld [vmem:[%s2254_s15 + $0x48] sm:$0xff] }
 0x173   : > { %1198 = vst [vmem:[%s2554_s23 + $0x70] sm:$0xff] %v1197_v45 }
 0x175   : > { %v1217_v31 = vld [vmem:[%s2254_s15 + $0x98] sm:$0xff] }
 0x176   : > { %1218 = vst [vmem:[%s2554_s23 + $0x110] sm:$0xff] %v1217_v31 }
 0x177 PF: > { %p11_p10 = scmp.ge.s32.totalorder %s1721_s19, 4   ;;  %s2710_s15 = smov %s1672_s16 }
 0x178   : > { %s2711_s16 = smov %s1732_s22  ;;  %s2712_s17 = smov %s1721_s19 }
 0x179   :  { %13 = sbr.rel (!%p11_p10) target bundleno = 2 (0x2), region = 126 }

</bundles_post_ra>
